<compile_context>
chip_gen: v5e
topology: v5e:2x2
jax: 0.10.0
libtpu: 0.0.40
codegen_flags: <defaults>
</compile_context>

<pallas_src>
import functools
import math

import jax
import jax.numpy as jnp
from jax import lax
from jax.experimental import pallas as pl
from jax.experimental.pallas import tpu as pltpu


# ----------------------------------------------------------------------------
# In-kernel helpers
# ----------------------------------------------------------------------------
def _layer_norm(v, gamma, beta, eps):
    mu = jnp.mean(v, axis=-1, keepdims=True)
    vc = v - mu
    var = jnp.mean(vc * vc, axis=-1, keepdims=True)
    inv = lax.rsqrt(var + eps)
    return vc * inv * gamma + beta


def _dot_bf16(a, w_bf16):
    # MXU matmul: bf16 inputs, f32 accumulation.
    return jnp.dot(a.astype(jnp.bfloat16), w_bf16,
                   preferred_element_type=jnp.float32)


# ----------------------------------------------------------------------------
# Fused encoder kernel (embedding LN + all layers + CLS -> fc head)
# ----------------------------------------------------------------------------
def _encoder_kernel(x_emb_ref, mask_ref, emb_ln_ref, fc_w_ref, fc_b_ref,
                    wqkv_ref, bqkv_ref, wo_ref, bo_ref, ln1_ref,
                    w1_ref, b1_ref, w2_ref, b2_ref, ln2_ref,
                    out_ref, x_scr,
                    *, seqs, seq_len, num_heads, head_dim, eps):
    layer = pl.program_id(1)                       # sequential layer axis
    H = num_heads * head_dim

    # --- layer 0: initialize the VMEM-resident activations (embedding LN) ---
    @pl.when(layer == 0)
    def _():
        emb = x_emb_ref[...]
        x_scr[...] = _layer_norm(emb, emb_ln_ref[0:1, :], emb_ln_ref[1:2, :], eps)

    x = x_scr[...]                                  # (TM, H) f32, stays in VMEM

    # --- fused QKV projection: one [H, 3H] MXU pass.
    #     1/sqrt(Dh) is folded into the Q columns of wqkv at pack time, so no
    #     per-head scale multiply is needed here.
    qkv = _dot_bf16(x, wqkv_ref[0]) + bqkv_ref[0]   # (TM, 3H) f32
    qkv_b16 = qkv.astype(jnp.bfloat16)              # single cast; sliced per head below

    # --- attention (full softmax; S is tiny).  Per-head contexts are collected and
    #     the wo out-projection is done once on the full (TM, H) block.
    # TODO(synk): for realistic S / nH, switch to a flash-style (q_tile, k_tile) grid
    #             and a lax.fori_loop(unroll=True) head loop to bound vreg live ranges.
    mask = mask_ref[...]                            # (seqs, S) additive key-mask bias
    ctx_rows = []
    for b in range(seqs):
        r0 = b * seq_len
        mb = mask[b:b + 1, :]                       # (1, S) broadcast over queries
        qkv_sb = qkv_b16[r0:r0 + seq_len, :]        # (S, 3H) bf16
        head_ctx = []
        for h in range(num_heads):
            c0 = h * head_dim
            q = qkv_sb[:, c0:c0 + head_dim]                         # pre-scaled (bf16)
            k = qkv_sb[:, H + c0:H + c0 + head_dim]
            v = qkv_sb[:, 2 * H + c0:2 * H + c0 + head_dim]
            s = lax.dot_general(q, k, (((1,), (1,)), ((), ())),
                                preferred_element_type=jnp.float32)  # q @ k^T  (S, S)
            s = s + mb
            m = jnp.max(s, axis=-1, keepdims=True)
            p = jnp.exp(s - m)
            denom = jnp.sum(p, axis=-1, keepdims=True)
            ctx = _dot_bf16(p, v)                                    # (S, Dh) f32
            # EUP reciprocal, not a VALU divide.
            # TODO(synk): use an exact divide for bit-level parity tests.
            ctx = ctx * pl.reciprocal(denom, approx=True)
            head_ctx.append(ctx)
        ctx_rows.append(jnp.concatenate(head_ctx, axis=-1))          # (S, H)
    ctx_all = jnp.concatenate(ctx_rows, axis=0)                      # (TM, H)

    # --- single fused out-projection + residual + post-attention LayerNorm
    #     (no VMEM staging scratch; everything stays a value) ---
    attn_out = _dot_bf16(ctx_all, wo_ref[0]) + bo_ref[0]             # one (TM,H)@(H,H)
    ln1 = ln1_ref[0]
    x = _layer_norm(attn_out + x, ln1[0:1, :], ln1[1:2, :], eps)

    # --- FFN + residual + LayerNorm ---
    ff = _dot_bf16(x, w1_ref[0]) + b1_ref[0]
    # TODO(synk): HF BERT uses exact erf-GELU; tanh approximation used here.
    ff = jax.nn.gelu(ff, approximate=True)
    ff = _dot_bf16(ff, w2_ref[0]) + b2_ref[0]
    ln2 = ln2_ref[0]
    x = _layer_norm(ff + x, ln2[0:1, :], ln2[1:2, :], eps)

    x_scr[...] = x                                  # carry to next layer

    # --- last layer: gather all CLS rows, ONE (seqs,H)@(H,DoutP) matmul, ONE store ---
    @pl.when(layer == pl.num_programs(1) - 1)
    def _():
        cls = jnp.concatenate(
            [x[b * seq_len:b * seq_len + 1, :] for b in range(seqs)], axis=0)  # (seqs,H)
        out_ref[...] = _dot_bf16(cls, fc_w_ref[...]) + fc_b_ref[...]


# ----------------------------------------------------------------------------
# Synthetic BERT-style TextEncoder parameters (deterministic), packed for the kernel
# ----------------------------------------------------------------------------
def init_params(key, *, vocab=100, max_pos=16, hidden=32, heads=4,
                num_layers=2, intermediate=64, output_dim=64, output_pad=128):
    H, I, L = hidden, intermediate, num_layers
    head_dim = H // heads
    scale = 1.0 / math.sqrt(head_dim)

    def nrm(k, shape):
        return 0.02 * jax.random.normal(k, shape, dtype=jnp.float32)

    keys = jax.random.split(key, 4 + 6 * L)
    ki = iter(keys)

    ln_unit = jnp.stack([jnp.ones((H,), jnp.float32),
                         jnp.zeros((H,), jnp.float32)], axis=0)       # [gamma; beta]

    p = {
        "cfg": dict(hidden=H, heads=heads, num_layers=L, intermediate=I,
                    output_dim=output_dim, output_dim_padded=output_pad,
                    max_pos=max_pos),
        "word_emb": nrm(next(ki), (vocab, H)),
        "pos_emb": nrm(next(ki), (max_pos, H)),
        "type_emb": nrm(next(ki), (2, H)),
        "emb_ln": ln_unit,                                            # (2, H)
    }

    wqkv, wo, w1, w2 = [], [], [], []
    for _ in range(L):
        # 1/sqrt(head_dim) folded into wq (and conceptually into the q bias, which is
        # zero here), so the kernel never multiplies by the attention scale.
        wq = nrm(next(ki), (H, H)) * scale
        wk = nrm(next(ki), (H, H))
        wv = nrm(next(ki), (H, H))
        wqkv.append(jnp.concatenate([wq, wk, wv], axis=1))            # fused QKV (H, 3H)
        wo.append(nrm(next(ki), (H, H)))
        w1.append(nrm(next(ki), (H, I)))
        w2.append(nrm(next(ki), (I, H)))

    # MXU weights stored in bf16 (f32 accumulation in-kernel); VPU-side params stay f32.
    p["wqkv"] = jnp.stack(wqkv).astype(jnp.bfloat16)                  # (L, H, 3H)
    p["wo"] = jnp.stack(wo).astype(jnp.bfloat16)                      # (L, H, H)
    p["w1"] = jnp.stack(w1).astype(jnp.bfloat16)                      # (L, H, I)
    p["w2"] = jnp.stack(w2).astype(jnp.bfloat16)                      # (L, I, H)
    p["bqkv"] = jnp.zeros((L, 1, 3 * H), jnp.float32)
    p["bo"] = jnp.zeros((L, 1, H), jnp.float32)
    p["b1"] = jnp.zeros((L, 1, I), jnp.float32)
    p["b2"] = jnp.zeros((L, 1, H), jnp.float32)
    p["ln1"] = jnp.tile(ln_unit[None], (L, 1, 1))                     # (L, 2, H)
    p["ln2"] = jnp.tile(ln_unit[None], (L, 1, 1))                     # (L, 2, H)

    # fc head, zero-padded to a lane-dense (128-wide) output slab
    fc_w = nrm(next(ki), (H, output_dim))
    p["fc_w"] = (jnp.zeros((H, output_pad), jnp.float32)
                 .at[:, :output_dim].set(fc_w)).astype(jnp.bfloat16)
    p["fc_b"] = jnp.zeros((1, output_pad), jnp.float32)
    return p


def _vmem_budget_bytes(TM, H, I, DoutP):
    """Explicit scoped-VMEM budget, capped v7x-safe (64 MiB physical there)."""
    act = TM * H * 4                                  # resident activation scratch
    io = 2 * (TM * H * 4)                             # double-buffered x_emb tile
    w_layer = (H * 3 * H + H * H + H * I + I * H) * 2 + (3 * H + 2 * H + I + 4 * H) * 4
    weights = 2 * w_layer                             # double-buffered per-layer weights
    head = H * DoutP * 2 + DoutP * 4 + TM * DoutP * 4
    need = act + io + weights + head
    return int(min(max(4 * need, 16 << 20), 56 << 20))  # headroom; stay under v7x 64 MiB


# ----------------------------------------------------------------------------
# Forward pass (mirrors TextEncoder.forward)
# ----------------------------------------------------------------------------
def text_encoder_forward(params, input_ids, attention_mask=None):
    cfg = params["cfg"]
    H, nH, L = cfg["hidden"], cfg["heads"], cfg["num_layers"]
    I, Dout, DoutP = cfg["intermediate"], cfg["output_dim"], cfg["output_dim_padded"]
    Dh = H // nH
    B, S = input_ids.shape
    M = B * S
    assert S <= cfg["max_pos"], "sequence length exceeds position-embedding table"

    if attention_mask is None:
        attention_mask = jnp.ones((B, S), dtype=jnp.int32)

    # --- embeddings (gather / broadcast adds are plain-JAX glue) ---
    # TODO(synk): token_type is hard-coded to 0 (matches single-sentence usage).
    x_emb = (params["word_emb"][input_ids]
             + params["pos_emb"][:S][None, :, :]
             + params["type_emb"][0][None, None, :]).astype(jnp.float32)
    x_emb = x_emb.reshape(M, H)

    # additive key mask [B, S]; the per-head broadcast happens inside the kernel
    mask_bias = (1.0 - attention_mask.astype(jnp.float32)) * -1e9

    # Row tiling: one tile at toy sizes; once B is large enough, split into >= 2 tiles
    # (each a multiple of 8 sequences, so the (8,128) block rule holds) so the
    # "parallel" row axis shards across both v7x TensorCores.  Tiles stay big
    # (hundreds of rows) rather than adding serial grid steps.
    if B % 16 == 0:
        seqs_per_tile = B // 2
    else:
        seqs_per_tile = B
    row_tiles = B // seqs_per_tile
    TM = seqs_per_tile * S

    kernel = functools.partial(
        _encoder_kernel, seqs=seqs_per_tile, seq_len=S,
        num_heads=nH, head_dim=Dh, eps=1e-12)

    # TODO(synk): when row_tiles > 1 and the full weight stack fits the per-generation
    #             VMEM budget, block weights over all L layers (index_map (0,0,0)) and
    #             index wqkv_ref[layer] in-kernel to avoid re-streaming them per row tile.
    grid_spec = pltpu.PrefetchScalarGridSpec(
        num_scalar_prefetch=0,
        grid=(row_tiles, L),
        in_specs=[
            pl.BlockSpec((TM, H), lambda r, l: (r, 0)),               # x_emb
            pl.BlockSpec((seqs_per_tile, S), lambda r, l: (r, 0)),    # mask bias
            pl.BlockSpec((2, H), lambda r, l: (0, 0)),                # emb LN
            pl.BlockSpec((H, DoutP), lambda r, l: (0, 0)),            # fc_w (padded)
            pl.BlockSpec((1, DoutP), lambda r, l: (0, 0)),            # fc_b (padded)
            pl.BlockSpec((1, H, 3 * H), lambda r, l: (l, 0, 0)),      # wqkv
            pl.BlockSpec((1, 1, 3 * H), lambda r, l: (l, 0, 0)),      # bqkv
            pl.BlockSpec((1, H, H), lambda r, l: (l, 0, 0)),          # wo
            pl.BlockSpec((1, 1, H), lambda r, l: (l, 0, 0)),          # bo
            pl.BlockSpec((1, 2, H), lambda r, l: (l, 0, 0)),          # ln1
            pl.BlockSpec((1, H, I), lambda r, l: (l, 0, 0)),          # w1
            pl.BlockSpec((1, 1, I), lambda r, l: (l, 0, 0)),          # b1
            pl.BlockSpec((1, I, H), lambda r, l: (l, 0, 0)),          # w2
            pl.BlockSpec((1, 1, H), lambda r, l: (l, 0, 0)),          # b2
            pl.BlockSpec((1, 2, H), lambda r, l: (l, 0, 0)),          # ln2
        ],
        out_specs=pl.BlockSpec((seqs_per_tile, DoutP), lambda r, l: (r, 0)),
        scratch_shapes=[
            pltpu.VMEM((TM, H), jnp.float32),    # resident activations across layers
        ],
    )

    out_padded = pl.pallas_call(
        kernel,
        out_shape=jax.ShapeDtypeStruct((B, DoutP), jnp.float32),
        grid_spec=grid_spec,
        compiler_params=pltpu.CompilerParams(
            dimension_semantics=("parallel", "arbitrary"),
            vmem_limit_bytes=_vmem_budget_bytes(TM, H, I, DoutP)),
    )(x_emb, mask_bias, params["emb_ln"], params["fc_w"], params["fc_b"],
      params["wqkv"], params["bqkv"], params["wo"], params["bo"], params["ln1"],
      params["w1"], params["b1"], params["w2"], params["b2"], params["ln2"])

    return out_padded[:, :Dout]                     # strip lane padding


# ----------------------------------------------------------------------------
if __name__ == "__main__":
    key = jax.random.PRNGKey(0)
    k_params, k_ids = jax.random.split(key)

    B, S, VOCAB, DOUT = 2, 8, 100, 64
    params = init_params(k_params, vocab=VOCAB, max_pos=16, hidden=32,
                         heads=4, num_layers=2, intermediate=64, output_dim=DOUT)

    input_ids = jax.random.randint(k_ids, (B, S), 0, VOCAB, dtype=jnp.int32)
    attention_mask = jnp.ones((B, S), dtype=jnp.int32).at[1, 6:].set(0)

    out = text_encoder_forward(params, input_ids, attention_mask)
    out = jax.block_until_ready(out)
    assert out.shape == (B, DOUT) and out.dtype == jnp.float32
    assert bool(jnp.all(jnp.isfinite(out)))
    print("KERNEL_OK")
</pallas_src>

<mosaic_0001>
module attributes {stable_mosaic.version = 11 : i64} {
  func.func @_encoder_kernel(%arg0: i32, %arg1: i32, %arg2: memref<16x32xf32, #tpu.memory_space<vmem>>, %arg3: memref<2x8xf32, #tpu.memory_space<vmem>>, %arg4: memref<2x32xf32, #tpu.memory_space<vmem>>, %arg5: memref<32x128xbf16, #tpu.memory_space<vmem>>, %arg6: memref<1x128xf32, #tpu.memory_space<vmem>>, %arg7: memref<1x32x96xbf16, #tpu.memory_space<vmem>>, %arg8: memref<1x1x96xf32, #tpu.memory_space<vmem>>, %arg9: memref<1x32x32xbf16, #tpu.memory_space<vmem>>, %arg10: memref<1x1x32xf32, #tpu.memory_space<vmem>>, %arg11: memref<1x2x32xf32, #tpu.memory_space<vmem>>, %arg12: memref<1x32x64xbf16, #tpu.memory_space<vmem>>, %arg13: memref<1x1x64xf32, #tpu.memory_space<vmem>>, %arg14: memref<1x64x32xbf16, #tpu.memory_space<vmem>>, %arg15: memref<1x1x32xf32, #tpu.memory_space<vmem>>, %arg16: memref<1x2x32xf32, #tpu.memory_space<vmem>>, %arg17: memref<2x128xf32, #tpu.memory_space<vmem>>, %arg18: memref<16x32xf32, #tpu.memory_space<vmem>>) attributes {dimension_semantics = [#tpu.dimension_semantics<parallel>, #tpu.dimension_semantics<arbitrary>], iteration_bounds = array<i64: 1, 2>, scalar_prefetch = 0 : i64, scratch_operands = 1 : i64, tpu.core_type = #tpu.core_type<tc>, window_params = [{transform_indices = @transform_0, window_bounds = array<i64: 16, 32>}, {transform_indices = @transform_1, window_bounds = array<i64: 2, 8>}, {pipeline_mode = #tpu.pipeline_mode<synchronous>, transform_indices = @transform_2, window_bounds = array<i64: 2, 32>}, {pipeline_mode = #tpu.pipeline_mode<synchronous>, transform_indices = @transform_3, window_bounds = array<i64: 32, 128>}, {pipeline_mode = #tpu.pipeline_mode<synchronous>, transform_indices = @transform_4, window_bounds = array<i64: 1, 128>}, {transform_indices = @transform_5, window_bounds = array<i64: 1, 32, 96>}, {transform_indices = @transform_6, window_bounds = array<i64: 1, 1, 96>}, {transform_indices = @transform_7, window_bounds = array<i64: 1, 32, 32>}, {transform_indices = @transform_8, window_bounds = array<i64: 1, 1, 32>}, {transform_indices = @transform_9, window_bounds = array<i64: 1, 2, 32>}, {transform_indices = @transform_10, window_bounds = array<i64: 1, 32, 64>}, {transform_indices = @transform_11, window_bounds = array<i64: 1, 1, 64>}, {transform_indices = @transform_12, window_bounds = array<i64: 1, 64, 32>}, {transform_indices = @transform_13, window_bounds = array<i64: 1, 1, 32>}, {transform_indices = @transform_14, window_bounds = array<i64: 1, 2, 32>}, {transform_indices = @transform_15, window_bounds = array<i64: 2, 128>}]} {
    %c0_i32 = arith.constant 0 : i32
    %0 = arith.cmpi eq, %arg1, %c0_i32 : i32
    %1 = arith.extui %0 : i1 to i32
    %c0_i32_0 = arith.constant 0 : i32
    %2 = arith.cmpi ne, %1, %c0_i32_0 : i32
    scf.if %2 {
      %c0_86 = arith.constant 0 : index
      %c0_87 = arith.constant 0 : index
      %256 = vector.load %arg2[%c0_86, %c0_87] : memref<16x32xf32, #tpu.memory_space<vmem>>, vector<16x32xf32>
      %c0_88 = arith.constant 0 : index
      %c0_89 = arith.constant 0 : index
      %257 = vector.load %arg4[%c0_88, %c0_89] : memref<2x32xf32, #tpu.memory_space<vmem>>, vector<1x32xf32>
      %c1 = arith.constant 1 : index
      %c0_90 = arith.constant 0 : index
      %258 = vector.load %arg4[%c1, %c0_90] : memref<2x32xf32, #tpu.memory_space<vmem>>, vector<1x32xf32>
      %cst_91 = arith.constant dense<0.000000e+00> : vector<16xf32>
      %259 = vector.multi_reduction <add>, %256, %cst_91 [1] : vector<16x32xf32> to vector<16xf32>
      %260 = vector.shape_cast %259 : vector<16xf32> to vector<16x1xf32>
      %cst_92 = arith.constant 3.200000e+01 : f32
      %261 = vector.broadcast %cst_92 : f32 to vector<16x1xf32>
      %262 = arith.divf %260, %261 : vector<16x1xf32>
      %263 = vector.broadcast %262 : vector<16x1xf32> to vector<16x32xf32>
      %264 = arith.subf %256, %263 : vector<16x32xf32>
      %265 = arith.mulf %264, %264 : vector<16x32xf32>
      %cst_93 = arith.constant dense<0.000000e+00> : vector<16xf32>
      %266 = vector.multi_reduction <add>, %265, %cst_93 [1] : vector<16x32xf32> to vector<16xf32>
      %267 = vector.shape_cast %266 : vector<16xf32> to vector<16x1xf32>
      %cst_94 = arith.constant 3.200000e+01 : f32
      %268 = vector.broadcast %cst_94 : f32 to vector<16x1xf32>
      %269 = arith.divf %267, %268 : vector<16x1xf32>
      %cst_95 = arith.constant 9.99999996E-13 : f32
      %270 = vector.broadcast %cst_95 : f32 to vector<16x1xf32>
      %271 = arith.addf %269, %270 : vector<16x1xf32>
      %272 = math.rsqrt %271 : vector<16x1xf32>
      %273 = vector.broadcast %272 : vector<16x1xf32> to vector<16x32xf32>
      %274 = arith.mulf %264, %273 : vector<16x32xf32>
      %275 = vector.broadcast %257 : vector<1x32xf32> to vector<16x32xf32>
      %276 = arith.mulf %274, %275 : vector<16x32xf32>
      %277 = vector.broadcast %258 : vector<1x32xf32> to vector<16x32xf32>
      %278 = arith.addf %276, %277 : vector<16x32xf32>
      %c0_96 = arith.constant 0 : index
      %c0_97 = arith.constant 0 : index
      %279 = vector.load %arg18[%c0_96, %c0_97] : memref<16x32xf32, #tpu.memory_space<vmem>>, vector<16x32xf32>
      tpu.vector_store %arg18[%c0_96, %c0_97], %278 {strides = array<i32>} : memref<16x32xf32, #tpu.memory_space<vmem>>, vector<16x32xf32>,
    } else {
    }
    %c0 = arith.constant 0 : index
    %c0_1 = arith.constant 0 : index
    %3 = vector.load %arg18[%c0, %c0_1] : memref<16x32xf32, #tpu.memory_space<vmem>>, vector<16x32xf32>
    %c0_2 = arith.constant 0 : index
    %c0_3 = arith.constant 0 : index
    %c0_4 = arith.constant 0 : index
    %4 = vector.load %arg7[%c0_2, %c0_3, %c0_4] : memref<1x32x96xbf16, #tpu.memory_space<vmem>>, vector<1x32x96xbf16>
    %5 = vector.shape_cast %4 : vector<1x32x96xbf16> to vector<32x96xbf16>
    %6 = arith.truncf %3 : vector<16x32xf32> to vector<16x32xbf16>
    %cst = arith.constant dense<0.000000e+00> : vector<16x96xf32>
    %7 = tpu.matmul %6, %5, %cst {dimension_numbers = #tpu.dot_dimension_numbers<[1], [0], [0], [1], [0, 0, 1, 1], [], []>} : vector<16x32xbf16>, vector<32x96xbf16>, vector<16x96xf32> -> vector<16x96xf32>
    %c0_5 = arith.constant 0 : index
    %c0_6 = arith.constant 0 : index
    %c0_7 = arith.constant 0 : index
    %8 = vector.load %arg8[%c0_5, %c0_6, %c0_7] : memref<1x1x96xf32, #tpu.memory_space<vmem>>, vector<1x1x96xf32>
    %9 = vector.shape_cast %8 : vector<1x1x96xf32> to vector<1x96xf32>
    %10 = vector.broadcast %9 : vector<1x96xf32> to vector<16x96xf32>
    %11 = arith.addf %7, %10 : vector<16x96xf32>
    %12 = arith.truncf %11 : vector<16x96xf32> to vector<16x96xbf16>
    %c0_8 = arith.constant 0 : index
    %c0_9 = arith.constant 0 : index
    %13 = vector.load %arg3[%c0_8, %c0_9] : memref<2x8xf32, #tpu.memory_space<vmem>>, vector<2x8xf32>
    %14 = vector.extract_strided_slice %13 {offsets = [0, 0], sizes = [1, 8], strides = [1, 1]} : vector<2x8xf32> to vector<1x8xf32>
    %15 = vector.extract_strided_slice %12 {offsets = [0, 0], sizes = [8, 96], strides = [1, 1]} : vector<16x96xbf16> to vector<8x96xbf16>
    %16 = vector.extract_strided_slice %15 {offsets = [0, 0], sizes = [8, 8], strides = [1, 1]} : vector<8x96xbf16> to vector<8x8xbf16>
    %17 = vector.extract_strided_slice %15 {offsets = [0, 32], sizes = [8, 8], strides = [1, 1]} : vector<8x96xbf16> to vector<8x8xbf16>
    %18 = vector.extract_strided_slice %15 {offsets = [0, 64], sizes = [8, 8], strides = [1, 1]} : vector<8x96xbf16> to vector<8x8xbf16>
    %cst_10 = arith.constant dense<0.000000e+00> : vector<8x8xf32>
    %19 = tpu.matmul %16, %17, %cst_10 {dimension_numbers = #tpu.dot_dimension_numbers<[1], [1], [0], [0], [0, 0, 1, 0], [], []>} : vector<8x8xbf16>, vector<8x8xbf16>, vector<8x8xf32> -> vector<8x8xf32>
    %20 = vector.broadcast %14 : vector<1x8xf32> to vector<8x8xf32>
    %21 = arith.addf %19, %20 : vector<8x8xf32>
    %cst_11 = arith.constant dense<0xFF800000> : vector<8xf32>
    %22 = vector.multi_reduction <maximumf>, %21, %cst_11 [1] : vector<8x8xf32> to vector<8xf32>
    %23 = vector.shape_cast %22 : vector<8xf32> to vector<8x1xf32>
    %24 = vector.broadcast %23 : vector<8x1xf32> to vector<8x8xf32>
    %25 = arith.subf %21, %24 : vector<8x8xf32>
    %26 = math.exp %25 : vector<8x8xf32>
    %cst_12 = arith.constant dense<0.000000e+00> : vector<8xf32>
    %27 = vector.multi_reduction <add>, %26, %cst_12 [1] : vector<8x8xf32> to vector<8xf32>
    %28 = vector.shape_cast %27 : vector<8xf32> to vector<8x1xf32>
    %29 = arith.truncf %26 : vector<8x8xf32> to vector<8x8xbf16>
    %cst_13 = arith.constant dense<0.000000e+00> : vector<8x8xf32>
    %30 = tpu.matmul %29, %18, %cst_13 {dimension_numbers = #tpu.dot_dimension_numbers<[1], [0], [0], [1], [0, 0, 1, 1], [], []>} : vector<8x8xbf16>, vector<8x8xbf16>, vector<8x8xf32> -> vector<8x8xf32>
    %31 = tpu.reciprocal %28 {approx = true} : vector<8x1xf32> -> vector<8x1xf32>
    %32 = vector.broadcast %31 : vector<8x1xf32> to vector<8x8xf32>
    %33 = arith.mulf %30, %32 : vector<8x8xf32>
    %34 = vector.extract_strided_slice %15 {offsets = [0, 8], sizes = [8, 8], strides = [1, 1]} : vector<8x96xbf16> to vector<8x8xbf16>
    %35 = vector.extract_strided_slice %15 {offsets = [0, 40], sizes = [8, 8], strides = [1, 1]} : vector<8x96xbf16> to vector<8x8xbf16>
    %36 = vector.extract_strided_slice %15 {offsets = [0, 72], sizes = [8, 8], strides = [1, 1]} : vector<8x96xbf16> to vector<8x8xbf16>
    %cst_14 = arith.constant dense<0.000000e+00> : vector<8x8xf32>
    %37 = tpu.matmul %34, %35, %cst_14 {dimension_numbers = #tpu.dot_dimension_numbers<[1], [1], [0], [0], [0, 0, 1, 0], [], []>} : vector<8x8xbf16>, vector<8x8xbf16>, vector<8x8xf32> -> vector<8x8xf32>
    %38 = vector.broadcast %14 : vector<1x8xf32> to vector<8x8xf32>
    %39 = arith.addf %37, %38 : vector<8x8xf32>
    %cst_15 = arith.constant dense<0xFF800000> : vector<8xf32>
    %40 = vector.multi_reduction <maximumf>, %39, %cst_15 [1] : vector<8x8xf32> to vector<8xf32>
    %41 = vector.shape_cast %40 : vector<8xf32> to vector<8x1xf32>
    %42 = vector.broadcast %41 : vector<8x1xf32> to vector<8x8xf32>
    %43 = arith.subf %39, %42 : vector<8x8xf32>
    %44 = math.exp %43 : vector<8x8xf32>
    %cst_16 = arith.constant dense<0.000000e+00> : vector<8xf32>
    %45 = vector.multi_reduction <add>, %44, %cst_16 [1] : vector<8x8xf32> to vector<8xf32>
    %46 = vector.shape_cast %45 : vector<8xf32> to vector<8x1xf32>
    %47 = arith.truncf %44 : vector<8x8xf32> to vector<8x8xbf16>
    %cst_17 = arith.constant dense<0.000000e+00> : vector<8x8xf32>
    %48 = tpu.matmul %47, %36, %cst_17 {dimension_numbers = #tpu.dot_dimension_numbers<[1], [0], [0], [1], [0, 0, 1, 1], [], []>} : vector<8x8xbf16>, vector<8x8xbf16>, vector<8x8xf32> -> vector<8x8xf32>
    %49 = tpu.reciprocal %46 {approx = true} : vector<8x1xf32> -> vector<8x1xf32>
    %50 = vector.broadcast %49 : vector<8x1xf32> to vector<8x8xf32>
    %51 = arith.mulf %48, %50 : vector<8x8xf32>
    %52 = vector.extract_strided_slice %15 {offsets = [0, 16], sizes = [8, 8], strides = [1, 1]} : vector<8x96xbf16> to vector<8x8xbf16>
    %53 = vector.extract_strided_slice %15 {offsets = [0, 48], sizes = [8, 8], strides = [1, 1]} : vector<8x96xbf16> to vector<8x8xbf16>
    %54 = vector.extract_strided_slice %15 {offsets = [0, 80], sizes = [8, 8], strides = [1, 1]} : vector<8x96xbf16> to vector<8x8xbf16>
    %cst_18 = arith.constant dense<0.000000e+00> : vector<8x8xf32>
    %55 = tpu.matmul %52, %53, %cst_18 {dimension_numbers = #tpu.dot_dimension_numbers<[1], [1], [0], [0], [0, 0, 1, 0], [], []>} : vector<8x8xbf16>, vector<8x8xbf16>, vector<8x8xf32> -> vector<8x8xf32>
    %56 = vector.broadcast %14 : vector<1x8xf32> to vector<8x8xf32>
    %57 = arith.addf %55, %56 : vector<8x8xf32>
    %cst_19 = arith.constant dense<0xFF800000> : vector<8xf32>
    %58 = vector.multi_reduction <maximumf>, %57, %cst_19 [1] : vector<8x8xf32> to vector<8xf32>
    %59 = vector.shape_cast %58 : vector<8xf32> to vector<8x1xf32>
    %60 = vector.broadcast %59 : vector<8x1xf32> to vector<8x8xf32>
    %61 = arith.subf %57, %60 : vector<8x8xf32>
    %62 = math.exp %61 : vector<8x8xf32>
    %cst_20 = arith.constant dense<0.000000e+00> : vector<8xf32>
    %63 = vector.multi_reduction <add>, %62, %cst_20 [1] : vector<8x8xf32> to vector<8xf32>
    %64 = vector.shape_cast %63 : vector<8xf32> to vector<8x1xf32>
    %65 = arith.truncf %62 : vector<8x8xf32> to vector<8x8xbf16>
    %cst_21 = arith.constant dense<0.000000e+00> : vector<8x8xf32>
    %66 = tpu.matmul %65, %54, %cst_21 {dimension_numbers = #tpu.dot_dimension_numbers<[1], [0], [0], [1], [0, 0, 1, 1], [], []>} : vector<8x8xbf16>, vector<8x8xbf16>, vector<8x8xf32> -> vector<8x8xf32>
    %67 = tpu.reciprocal %64 {approx = true} : vector<8x1xf32> -> vector<8x1xf32>
    %68 = vector.broadcast %67 : vector<8x1xf32> to vector<8x8xf32>
    %69 = arith.mulf %66, %68 : vector<8x8xf32>
    %70 = vector.extract_strided_slice %15 {offsets = [0, 24], sizes = [8, 8], strides = [1, 1]} : vector<8x96xbf16> to vector<8x8xbf16>
    %71 = vector.extract_strided_slice %15 {offsets = [0, 56], sizes = [8, 8], strides = [1, 1]} : vector<8x96xbf16> to vector<8x8xbf16>
    %72 = vector.extract_strided_slice %15 {offsets = [0, 88], sizes = [8, 8], strides = [1, 1]} : vector<8x96xbf16> to vector<8x8xbf16>
    %cst_22 = arith.constant dense<0.000000e+00> : vector<8x8xf32>
    %73 = tpu.matmul %70, %71, %cst_22 {dimension_numbers = #tpu.dot_dimension_numbers<[1], [1], [0], [0], [0, 0, 1, 0], [], []>} : vector<8x8xbf16>, vector<8x8xbf16>, vector<8x8xf32> -> vector<8x8xf32>
    %74 = vector.broadcast %14 : vector<1x8xf32> to vector<8x8xf32>
    %75 = arith.addf %73, %74 : vector<8x8xf32>
    %cst_23 = arith.constant dense<0xFF800000> : vector<8xf32>
    %76 = vector.multi_reduction <maximumf>, %75, %cst_23 [1] : vector<8x8xf32> to vector<8xf32>
    %77 = vector.shape_cast %76 : vector<8xf32> to vector<8x1xf32>
    %78 = vector.broadcast %77 : vector<8x1xf32> to vector<8x8xf32>
    %79 = arith.subf %75, %78 : vector<8x8xf32>
    %80 = math.exp %79 : vector<8x8xf32>
    %cst_24 = arith.constant dense<0.000000e+00> : vector<8xf32>
    %81 = vector.multi_reduction <add>, %80, %cst_24 [1] : vector<8x8xf32> to vector<8xf32>
    %82 = vector.shape_cast %81 : vector<8xf32> to vector<8x1xf32>
    %83 = arith.truncf %80 : vector<8x8xf32> to vector<8x8xbf16>
    %cst_25 = arith.constant dense<0.000000e+00> : vector<8x8xf32>
    %84 = tpu.matmul %83, %72, %cst_25 {dimension_numbers = #tpu.dot_dimension_numbers<[1], [0], [0], [1], [0, 0, 1, 1], [], []>} : vector<8x8xbf16>, vector<8x8xbf16>, vector<8x8xf32> -> vector<8x8xf32>
    %85 = tpu.reciprocal %82 {approx = true} : vector<8x1xf32> -> vector<8x1xf32>
    %86 = vector.broadcast %85 : vector<8x1xf32> to vector<8x8xf32>
    %87 = arith.mulf %84, %86 : vector<8x8xf32>
    %88 = tpu.concatenate %33, %51, %69, %87 in 1 : vector<8x8xf32>, vector<8x8xf32>, vector<8x8xf32>, vector<8x8xf32> -> vector<8x32xf32>
    %89 = vector.extract_strided_slice %13 {offsets = [1, 0], sizes = [1, 8], strides = [1, 1]} : vector<2x8xf32> to vector<1x8xf32>
    %90 = vector.extract_strided_slice %12 {offsets = [8, 0], sizes = [8, 96], strides = [1, 1]} : vector<16x96xbf16> to vector<8x96xbf16>
    %91 = vector.extract_strided_slice %90 {offsets = [0, 0], sizes = [8, 8], strides = [1, 1]} : vector<8x96xbf16> to vector<8x8xbf16>
    %92 = vector.extract_strided_slice %90 {offsets = [0, 32], sizes = [8, 8], strides = [1, 1]} : vector<8x96xbf16> to vector<8x8xbf16>
    %93 = vector.extract_strided_slice %90 {offsets = [0, 64], sizes = [8, 8], strides = [1, 1]} : vector<8x96xbf16> to vector<8x8xbf16>
    %cst_26 = arith.constant dense<0.000000e+00> : vector<8x8xf32>
    %94 = tpu.matmul %91, %92, %cst_26 {dimension_numbers = #tpu.dot_dimension_numbers<[1], [1], [0], [0], [0, 0, 1, 0], [], []>} : vector<8x8xbf16>, vector<8x8xbf16>, vector<8x8xf32> -> vector<8x8xf32>
    %95 = vector.broadcast %89 : vector<1x8xf32> to vector<8x8xf32>
    %96 = arith.addf %94, %95 : vector<8x8xf32>
    %cst_27 = arith.constant dense<0xFF800000> : vector<8xf32>
    %97 = vector.multi_reduction <maximumf>, %96, %cst_27 [1] : vector<8x8xf32> to vector<8xf32>
    %98 = vector.shape_cast %97 : vector<8xf32> to vector<8x1xf32>
    %99 = vector.broadcast %98 : vector<8x1xf32> to vector<8x8xf32>
    %100 = arith.subf %96, %99 : vector<8x8xf32>
    %101 = math.exp %100 : vector<8x8xf32>
    %cst_28 = arith.constant dense<0.000000e+00> : vector<8xf32>
    %102 = vector.multi_reduction <add>, %101, %cst_28 [1] : vector<8x8xf32> to vector<8xf32>
    %103 = vector.shape_cast %102 : vector<8xf32> to vector<8x1xf32>
    %104 = arith.truncf %101 : vector<8x8xf32> to vector<8x8xbf16>
    %cst_29 = arith.constant dense<0.000000e+00> : vector<8x8xf32>
    %105 = tpu.matmul %104, %93, %cst_29 {dimension_numbers = #tpu.dot_dimension_numbers<[1], [0], [0], [1], [0, 0, 1, 1], [], []>} : vector<8x8xbf16>, vector<8x8xbf16>, vector<8x8xf32> -> vector<8x8xf32>
    %106 = tpu.reciprocal %103 {approx = true} : vector<8x1xf32> -> vector<8x1xf32>
    %107 = vector.broadcast %106 : vector<8x1xf32> to vector<8x8xf32>
    %108 = arith.mulf %105, %107 : vector<8x8xf32>
    %109 = vector.extract_strided_slice %90 {offsets = [0, 8], sizes = [8, 8], strides = [1, 1]} : vector<8x96xbf16> to vector<8x8xbf16>
    %110 = vector.extract_strided_slice %90 {offsets = [0, 40], sizes = [8, 8], strides = [1, 1]} : vector<8x96xbf16> to vector<8x8xbf16>
    %111 = vector.extract_strided_slice %90 {offsets = [0, 72], sizes = [8, 8], strides = [1, 1]} : vector<8x96xbf16> to vector<8x8xbf16>
    %cst_30 = arith.constant dense<0.000000e+00> : vector<8x8xf32>
    %112 = tpu.matmul %109, %110, %cst_30 {dimension_numbers = #tpu.dot_dimension_numbers<[1], [1], [0], [0], [0, 0, 1, 0], [], []>} : vector<8x8xbf16>, vector<8x8xbf16>, vector<8x8xf32> -> vector<8x8xf32>
    %113 = vector.broadcast %89 : vector<1x8xf32> to vector<8x8xf32>
    %114 = arith.addf %112, %113 : vector<8x8xf32>
    %cst_31 = arith.constant dense<0xFF800000> : vector<8xf32>
    %115 = vector.multi_reduction <maximumf>, %114, %cst_31 [1] : vector<8x8xf32> to vector<8xf32>
    %116 = vector.shape_cast %115 : vector<8xf32> to vector<8x1xf32>
    %117 = vector.broadcast %116 : vector<8x1xf32> to vector<8x8xf32>
    %118 = arith.subf %114, %117 : vector<8x8xf32>
    %119 = math.exp %118 : vector<8x8xf32>
    %cst_32 = arith.constant dense<0.000000e+00> : vector<8xf32>
    %120 = vector.multi_reduction <add>, %119, %cst_32 [1] : vector<8x8xf32> to vector<8xf32>
    %121 = vector.shape_cast %120 : vector<8xf32> to vector<8x1xf32>
    %122 = arith.truncf %119 : vector<8x8xf32> to vector<8x8xbf16>
    %cst_33 = arith.constant dense<0.000000e+00> : vector<8x8xf32>
    %123 = tpu.matmul %122, %111, %cst_33 {dimension_numbers = #tpu.dot_dimension_numbers<[1], [0], [0], [1], [0, 0, 1, 1], [], []>} : vector<8x8xbf16>, vector<8x8xbf16>, vector<8x8xf32> -> vector<8x8xf32>
    %124 = tpu.reciprocal %121 {approx = true} : vector<8x1xf32> -> vector<8x1xf32>
    %125 = vector.broadcast %124 : vector<8x1xf32> to vector<8x8xf32>
    %126 = arith.mulf %123, %125 : vector<8x8xf32>
    %127 = vector.extract_strided_slice %90 {offsets = [0, 16], sizes = [8, 8], strides = [1, 1]} : vector<8x96xbf16> to vector<8x8xbf16>
    %128 = vector.extract_strided_slice %90 {offsets = [0, 48], sizes = [8, 8], strides = [1, 1]} : vector<8x96xbf16> to vector<8x8xbf16>
    %129 = vector.extract_strided_slice %90 {offsets = [0, 80], sizes = [8, 8], strides = [1, 1]} : vector<8x96xbf16> to vector<8x8xbf16>
    %cst_34 = arith.constant dense<0.000000e+00> : vector<8x8xf32>
    %130 = tpu.matmul %127, %128, %cst_34 {dimension_numbers = #tpu.dot_dimension_numbers<[1], [1], [0], [0], [0, 0, 1, 0], [], []>} : vector<8x8xbf16>, vector<8x8xbf16>, vector<8x8xf32> -> vector<8x8xf32>
    %131 = vector.broadcast %89 : vector<1x8xf32> to vector<8x8xf32>
    %132 = arith.addf %130, %131 : vector<8x8xf32>
    %cst_35 = arith.constant dense<0xFF800000> : vector<8xf32>
    %133 = vector.multi_reduction <maximumf>, %132, %cst_35 [1] : vector<8x8xf32> to vector<8xf32>
    %134 = vector.shape_cast %133 : vector<8xf32> to vector<8x1xf32>
    %135 = vector.broadcast %134 : vector<8x1xf32> to vector<8x8xf32>
    %136 = arith.subf %132, %135 : vector<8x8xf32>
    %137 = math.exp %136 : vector<8x8xf32>
    %cst_36 = arith.constant dense<0.000000e+00> : vector<8xf32>
    %138 = vector.multi_reduction <add>, %137, %cst_36 [1] : vector<8x8xf32> to vector<8xf32>
    %139 = vector.shape_cast %138 : vector<8xf32> to vector<8x1xf32>
    %140 = arith.truncf %137 : vector<8x8xf32> to vector<8x8xbf16>
    %cst_37 = arith.constant dense<0.000000e+00> : vector<8x8xf32>
    %141 = tpu.matmul %140, %129, %cst_37 {dimension_numbers = #tpu.dot_dimension_numbers<[1], [0], [0], [1], [0, 0, 1, 1], [], []>} : vector<8x8xbf16>, vector<8x8xbf16>, vector<8x8xf32> -> vector<8x8xf32>
    %142 = tpu.reciprocal %139 {approx = true} : vector<8x1xf32> -> vector<8x1xf32>
    %143 = vector.broadcast %142 : vector<8x1xf32> to vector<8x8xf32>
    %144 = arith.mulf %141, %143 : vector<8x8xf32>
    %145 = vector.extract_strided_slice %90 {offsets = [0, 24], sizes = [8, 8], strides = [1, 1]} : vector<8x96xbf16> to vector<8x8xbf16>
    %146 = vector.extract_strided_slice %90 {offsets = [0, 56], sizes = [8, 8], strides = [1, 1]} : vector<8x96xbf16> to vector<8x8xbf16>
    %147 = vector.extract_strided_slice %90 {offsets = [0, 88], sizes = [8, 8], strides = [1, 1]} : vector<8x96xbf16> to vector<8x8xbf16>
    %cst_38 = arith.constant dense<0.000000e+00> : vector<8x8xf32>
    %148 = tpu.matmul %145, %146, %cst_38 {dimension_numbers = #tpu.dot_dimension_numbers<[1], [1], [0], [0], [0, 0, 1, 0], [], []>} : vector<8x8xbf16>, vector<8x8xbf16>, vector<8x8xf32> -> vector<8x8xf32>
    %149 = vector.broadcast %89 : vector<1x8xf32> to vector<8x8xf32>
    %150 = arith.addf %148, %149 : vector<8x8xf32>
    %cst_39 = arith.constant dense<0xFF800000> : vector<8xf32>
    %151 = vector.multi_reduction <maximumf>, %150, %cst_39 [1] : vector<8x8xf32> to vector<8xf32>
    %152 = vector.shape_cast %151 : vector<8xf32> to vector<8x1xf32>
    %153 = vector.broadcast %152 : vector<8x1xf32> to vector<8x8xf32>
    %154 = arith.subf %150, %153 : vector<8x8xf32>
    %155 = math.exp %154 : vector<8x8xf32>
    %cst_40 = arith.constant dense<0.000000e+00> : vector<8xf32>
    %156 = vector.multi_reduction <add>, %155, %cst_40 [1] : vector<8x8xf32> to vector<8xf32>
    %157 = vector.shape_cast %156 : vector<8xf32> to vector<8x1xf32>
    %158 = arith.truncf %155 : vector<8x8xf32> to vector<8x8xbf16>
    %cst_41 = arith.constant dense<0.000000e+00> : vector<8x8xf32>
    %159 = tpu.matmul %158, %147, %cst_41 {dimension_numbers = #tpu.dot_dimension_numbers<[1], [0], [0], [1], [0, 0, 1, 1], [], []>} : vector<8x8xbf16>, vector<8x8xbf16>, vector<8x8xf32> -> vector<8x8xf32>
    %160 = tpu.reciprocal %157 {approx = true} : vector<8x1xf32> -> vector<8x1xf32>
    %161 = vector.broadcast %160 : vector<8x1xf32> to vector<8x8xf32>
    %162 = arith.mulf %159, %161 : vector<8x8xf32>
    %163 = tpu.concatenate %108, %126, %144, %162 in 1 : vector<8x8xf32>, vector<8x8xf32>, vector<8x8xf32>, vector<8x8xf32> -> vector<8x32xf32>
    %164 = tpu.concatenate %88, %163 in 0 : vector<8x32xf32>, vector<8x32xf32> -> vector<16x32xf32>
    %c0_42 = arith.constant 0 : index
    %c0_43 = arith.constant 0 : index
    %c0_44 = arith.constant 0 : index
    %165 = vector.load %arg9[%c0_42, %c0_43, %c0_44] : memref<1x32x32xbf16, #tpu.memory_space<vmem>>, vector<1x32x32xbf16>
    %166 = vector.shape_cast %165 : vector<1x32x32xbf16> to vector<32x32xbf16>
    %167 = arith.truncf %164 : vector<16x32xf32> to vector<16x32xbf16>
    %cst_45 = arith.constant dense<0.000000e+00> : vector<16x32xf32>
    %168 = tpu.matmul %167, %166, %cst_45 {dimension_numbers = #tpu.dot_dimension_numbers<[1], [0], [0], [1], [0, 0, 1, 1], [], []>} : vector<16x32xbf16>, vector<32x32xbf16>, vector<16x32xf32> -> vector<16x32xf32>
    %c0_46 = arith.constant 0 : index
    %c0_47 = arith.constant 0 : index
    %c0_48 = arith.constant 0 : index
    %169 = vector.load %arg10[%c0_46, %c0_47, %c0_48] : memref<1x1x32xf32, #tpu.memory_space<vmem>>, vector<1x1x32xf32>
    %170 = vector.shape_cast %169 : vector<1x1x32xf32> to vector<1x32xf32>
    %171 = vector.broadcast %170 : vector<1x32xf32> to vector<16x32xf32>
    %172 = arith.addf %168, %171 : vector<16x32xf32>
    %c0_49 = arith.constant 0 : index
    %c0_50 = arith.constant 0 : index
    %c0_51 = arith.constant 0 : index
    %173 = vector.load %arg11[%c0_49, %c0_50, %c0_51] : memref<1x2x32xf32, #tpu.memory_space<vmem>>, vector<1x2x32xf32>
    %174 = vector.shape_cast %173 : vector<1x2x32xf32> to vector<2x32xf32>
    %175 = arith.addf %172, %3 : vector<16x32xf32>
    %176 = vector.extract_strided_slice %174 {offsets = [0, 0], sizes = [1, 32], strides = [1, 1]} : vector<2x32xf32> to vector<1x32xf32>
    %177 = vector.extract_strided_slice %174 {offsets = [1, 0], sizes = [1, 32], strides = [1, 1]} : vector<2x32xf32> to vector<1x32xf32>
    %cst_52 = arith.constant dense<0.000000e+00> : vector<16xf32>
    %178 = vector.multi_reduction <add>, %175, %cst_52 [1] : vector<16x32xf32> to vector<16xf32>
    %179 = vector.shape_cast %178 : vector<16xf32> to vector<16x1xf32>
    %cst_53 = arith.constant 3.200000e+01 : f32
    %180 = vector.broadcast %cst_53 : f32 to vector<16x1xf32>
    %181 = arith.divf %179, %180 : vector<16x1xf32>
    %182 = vector.broadcast %181 : vector<16x1xf32> to vector<16x32xf32>
    %183 = arith.subf %175, %182 : vector<16x32xf32>
    %184 = arith.mulf %183, %183 : vector<16x32xf32>
    %cst_54 = arith.constant dense<0.000000e+00> : vector<16xf32>
    %185 = vector.multi_reduction <add>, %184, %cst_54 [1] : vector<16x32xf32> to vector<16xf32>
    %186 = vector.shape_cast %185 : vector<16xf32> to vector<16x1xf32>
    %cst_55 = arith.constant 3.200000e+01 : f32
    %187 = vector.broadcast %cst_55 : f32 to vector<16x1xf32>
    %188 = arith.divf %186, %187 : vector<16x1xf32>
    %cst_56 = arith.constant 9.99999996E-13 : f32
    %189 = vector.broadcast %cst_56 : f32 to vector<16x1xf32>
    %190 = arith.addf %188, %189 : vector<16x1xf32>
    %191 = math.rsqrt %190 : vector<16x1xf32>
    %192 = vector.broadcast %191 : vector<16x1xf32> to vector<16x32xf32>
    %193 = arith.mulf %183, %192 : vector<16x32xf32>
    %194 = vector.broadcast %176 : vector<1x32xf32> to vector<16x32xf32>
    %195 = arith.mulf %193, %194 : vector<16x32xf32>
    %196 = vector.broadcast %177 : vector<1x32xf32> to vector<16x32xf32>
    %197 = arith.addf %195, %196 : vector<16x32xf32>
    %c0_57 = arith.constant 0 : index
    %c0_58 = arith.constant 0 : index
    %c0_59 = arith.constant 0 : index
    %198 = vector.load %arg12[%c0_57, %c0_58, %c0_59] : memref<1x32x64xbf16, #tpu.memory_space<vmem>>, vector<1x32x64xbf16>
    %199 = vector.shape_cast %198 : vector<1x32x64xbf16> to vector<32x64xbf16>
    %200 = arith.truncf %197 : vector<16x32xf32> to vector<16x32xbf16>
    %cst_60 = arith.constant dense<0.000000e+00> : vector<16x64xf32>
    %201 = tpu.matmul %200, %199, %cst_60 {dimension_numbers = #tpu.dot_dimension_numbers<[1], [0], [0], [1], [0, 0, 1, 1], [], []>} : vector<16x32xbf16>, vector<32x64xbf16>, vector<16x64xf32> -> vector<16x64xf32>
    %c0_61 = arith.constant 0 : index
    %c0_62 = arith.constant 0 : index
    %c0_63 = arith.constant 0 : index
    %202 = vector.load %arg13[%c0_61, %c0_62, %c0_63] : memref<1x1x64xf32, #tpu.memory_space<vmem>>, vector<1x1x64xf32>
    %203 = vector.shape_cast %202 : vector<1x1x64xf32> to vector<1x64xf32>
    %204 = vector.broadcast %203 : vector<1x64xf32> to vector<16x64xf32>
    %205 = arith.addf %201, %204 : vector<16x64xf32>
    %206 = arith.mulf %205, %205 : vector<16x64xf32>
    %207 = arith.mulf %205, %206 : vector<16x64xf32>
    %cst_64 = arith.constant 4.471500e-02 : f32
    %208 = vector.broadcast %cst_64 : f32 to vector<16x64xf32>
    %209 = arith.mulf %208, %207 : vector<16x64xf32>
    %210 = arith.addf %205, %209 : vector<16x64xf32>
    %cst_65 = arith.constant 0.797884583 : f32
    %211 = vector.broadcast %cst_65 : f32 to vector<16x64xf32>
    %212 = arith.mulf %211, %210 : vector<16x64xf32>
    %213 = math.tanh %212 : vector<16x64xf32>
    %cst_66 = arith.constant 1.000000e+00 : f32
    %214 = vector.broadcast %cst_66 : f32 to vector<16x64xf32>
    %215 = arith.addf %214, %213 : vector<16x64xf32>
    %cst_67 = arith.constant 5.000000e-01 : f32
    %216 = vector.broadcast %cst_67 : f32 to vector<16x64xf32>
    %217 = arith.mulf %216, %215 : vector<16x64xf32>
    %218 = arith.mulf %205, %217 : vector<16x64xf32>
    %c0_68 = arith.constant 0 : index
    %c0_69 = arith.constant 0 : index
    %c0_70 = arith.constant 0 : index
    %219 = vector.load %arg14[%c0_68, %c0_69, %c0_70] : memref<1x64x32xbf16, #tpu.memory_space<vmem>>, vector<1x64x32xbf16>
    %220 = vector.shape_cast %219 : vector<1x64x32xbf16> to vector<64x32xbf16>
    %221 = arith.truncf %218 : vector<16x64xf32> to vector<16x64xbf16>
    %cst_71 = arith.constant dense<0.000000e+00> : vector<16x32xf32>
    %222 = tpu.matmul %221, %220, %cst_71 {dimension_numbers = #tpu.dot_dimension_numbers<[1], [0], [0], [1], [0, 0, 1, 1], [], []>} : vector<16x64xbf16>, vector<64x32xbf16>, vector<16x32xf32> -> vector<16x32xf32>
    %c0_72 = arith.constant 0 : index
    %c0_73 = arith.constant 0 : index
    %c0_74 = arith.constant 0 : index
    %223 = vector.load %arg15[%c0_72, %c0_73, %c0_74] : memref<1x1x32xf32, #tpu.memory_space<vmem>>, vector<1x1x32xf32>
    %224 = vector.shape_cast %223 : vector<1x1x32xf32> to vector<1x32xf32>
    %225 = vector.broadcast %224 : vector<1x32xf32> to vector<16x32xf32>
    %226 = arith.addf %222, %225 : vector<16x32xf32>
    %c0_75 = arith.constant 0 : index
    %c0_76 = arith.constant 0 : index
    %c0_77 = arith.constant 0 : index
    %227 = vector.load %arg16[%c0_75, %c0_76, %c0_77] : memref<1x2x32xf32, #tpu.memory_space<vmem>>, vector<1x2x32xf32>
    %228 = vector.shape_cast %227 : vector<1x2x32xf32> to vector<2x32xf32>
    %229 = arith.addf %226, %197 : vector<16x32xf32>
    %230 = vector.extract_strided_slice %228 {offsets = [0, 0], sizes = [1, 32], strides = [1, 1]} : vector<2x32xf32> to vector<1x32xf32>
    %231 = vector.extract_strided_slice %228 {offsets = [1, 0], sizes = [1, 32], strides = [1, 1]} : vector<2x32xf32> to vector<1x32xf32>
    %cst_78 = arith.constant dense<0.000000e+00> : vector<16xf32>
    %232 = vector.multi_reduction <add>, %229, %cst_78 [1] : vector<16x32xf32> to vector<16xf32>
    %233 = vector.shape_cast %232 : vector<16xf32> to vector<16x1xf32>
    %cst_79 = arith.constant 3.200000e+01 : f32
    %234 = vector.broadcast %cst_79 : f32 to vector<16x1xf32>
    %235 = arith.divf %233, %234 : vector<16x1xf32>
    %236 = vector.broadcast %235 : vector<16x1xf32> to vector<16x32xf32>
    %237 = arith.subf %229, %236 : vector<16x32xf32>
    %238 = arith.mulf %237, %237 : vector<16x32xf32>
    %cst_80 = arith.constant dense<0.000000e+00> : vector<16xf32>
    %239 = vector.multi_reduction <add>, %238, %cst_80 [1] : vector<16x32xf32> to vector<16xf32>
    %240 = vector.shape_cast %239 : vector<16xf32> to vector<16x1xf32>
    %cst_81 = arith.constant 3.200000e+01 : f32
    %241 = vector.broadcast %cst_81 : f32 to vector<16x1xf32>
    %242 = arith.divf %240, %241 : vector<16x1xf32>
    %cst_82 = arith.constant 9.99999996E-13 : f32
    %243 = vector.broadcast %cst_82 : f32 to vector<16x1xf32>
    %244 = arith.addf %242, %243 : vector<16x1xf32>
    %245 = math.rsqrt %244 : vector<16x1xf32>
    %246 = vector.broadcast %245 : vector<16x1xf32> to vector<16x32xf32>
    %247 = arith.mulf %237, %246 : vector<16x32xf32>
    %248 = vector.broadcast %230 : vector<1x32xf32> to vector<16x32xf32>
    %249 = arith.mulf %247, %248 : vector<16x32xf32>
    %250 = vector.broadcast %231 : vector<1x32xf32> to vector<16x32xf32>
    %251 = arith.addf %249, %250 : vector<16x32xf32>
    %c0_83 = arith.constant 0 : index
    %c0_84 = arith.constant 0 : index
    %252 = vector.load %arg18[%c0_83, %c0_84] : memref<16x32xf32, #tpu.memory_space<vmem>>, vector<16x32xf32>
    tpu.vector_store %arg18[%c0_83, %c0_84], %251 {strides = array<i32>} : memref<16x32xf32, #tpu.memory_space<vmem>>, vector<16x32xf32>,
    %c1_i32 = arith.constant 1 : i32
    %253 = arith.cmpi eq, %arg1, %c1_i32 : i32
    %254 = arith.extui %253 : i1 to i32
    %c0_i32_85 = arith.constant 0 : i32
    %255 = arith.cmpi ne, %254, %c0_i32_85 : i32
    scf.if %255 {
      %256 = vector.extract_strided_slice %251 {offsets = [0, 0], sizes = [1, 32], strides = [1, 1]} : vector<16x32xf32> to vector<1x32xf32>
      %257 = vector.extract_strided_slice %251 {offsets = [8, 0], sizes = [1, 32], strides = [1, 1]} : vector<16x32xf32> to vector<1x32xf32>
      %258 = tpu.concatenate %256, %257 in 0 : vector<1x32xf32>, vector<1x32xf32> -> vector<2x32xf32>
      %c0_86 = arith.constant 0 : index
      %c0_87 = arith.constant 0 : index
      %259 = vector.load %arg5[%c0_86, %c0_87] : memref<32x128xbf16, #tpu.memory_space<vmem>>, vector<32x128xbf16>
      %260 = arith.truncf %258 : vector<2x32xf32> to vector<2x32xbf16>
      %cst_88 = arith.constant dense<0.000000e+00> : vector<2x128xf32>
      %261 = tpu.matmul %260, %259, %cst_88 {dimension_numbers = #tpu.dot_dimension_numbers<[1], [0], [0], [1], [0, 0, 1, 1], [], []>} : vector<2x32xbf16>, vector<32x128xbf16>, vector<2x128xf32> -> vector<2x128xf32>
      %c0_89 = arith.constant 0 : index
      %c0_90 = arith.constant 0 : index
      %262 = vector.load %arg6[%c0_89, %c0_90] : memref<1x128xf32, #tpu.memory_space<vmem>>, vector<1x128xf32>
      %263 = vector.broadcast %262 : vector<1x128xf32> to vector<2x128xf32>
      %264 = arith.addf %261, %263 : vector<2x128xf32>
      %c0_91 = arith.constant 0 : index
      %c0_92 = arith.constant 0 : index
      %265 = vector.load %arg17[%c0_91, %c0_92] : memref<2x128xf32, #tpu.memory_space<vmem>>, vector<2x128xf32>
      tpu.vector_store %arg17[%c0_91, %c0_92], %264 {strides = array<i32>} : memref<2x128xf32, #tpu.memory_space<vmem>>, vector<2x128xf32>,
    } else {
    }
    return
  }
  func.func @transform_0(%arg0: i32, %arg1: i32) -> (i32, i32) {
    %c0_i32 = arith.constant 0 : i32
    %c0_i32_0 = arith.constant 0 : i32
    return %arg0, %c0_i32 : i32, i32
  }
  func.func @transform_1(%arg0: i32, %arg1: i32) -> (i32, i32) {
    %c0_i32 = arith.constant 0 : i32
    %c0_i32_0 = arith.constant 0 : i32
    return %arg0, %c0_i32 : i32, i32
  }
  func.func @transform_2(%arg0: i32, %arg1: i32) -> (i32, i32) {
    %c0_i32 = arith.constant 0 : i32
    %c0_i32_0 = arith.constant 0 : i32
    %c0_i32_1 = arith.constant 0 : i32
    return %c0_i32, %c0_i32_0 : i32, i32
  }
  func.func @transform_3(%arg0: i32, %arg1: i32) -> (i32, i32) {
    %c0_i32 = arith.constant 0 : i32
    %c0_i32_0 = arith.constant 0 : i32
    %c0_i32_1 = arith.constant 0 : i32
    return %c0_i32, %c0_i32_0 : i32, i32
  }
  func.func @transform_4(%arg0: i32, %arg1: i32) -> (i32, i32) {
    %c0_i32 = arith.constant 0 : i32
    %c0_i32_0 = arith.constant 0 : i32
    %c0_i32_1 = arith.constant 0 : i32
    return %c0_i32, %c0_i32_0 : i32, i32
  }
  func.func @transform_5(%arg0: i32, %arg1: i32) -> (i32, i32, i32) {
    %c0_i32 = arith.constant 0 : i32
    %c0_i32_0 = arith.constant 0 : i32
    %c0_i32_1 = arith.constant 0 : i32
    return %arg1, %c0_i32, %c0_i32_0 : i32, i32, i32
  }
  func.func @transform_6(%arg0: i32, %arg1: i32) -> (i32, i32, i32) {
    %c0_i32 = arith.constant 0 : i32
    %c0_i32_0 = arith.constant 0 : i32
    %c0_i32_1 = arith.constant 0 : i32
    return %arg1, %c0_i32, %c0_i32_0 : i32, i32, i32
  }
  func.func @transform_7(%arg0: i32, %arg1: i32) -> (i32, i32, i32) {
    %c0_i32 = arith.constant 0 : i32
    %c0_i32_0 = arith.constant 0 : i32
    %c0_i32_1 = arith.constant 0 : i32
    return %arg1, %c0_i32, %c0_i32_0 : i32, i32, i32
  }
  func.func @transform_8(%arg0: i32, %arg1: i32) -> (i32, i32, i32) {
    %c0_i32 = arith.constant 0 : i32
    %c0_i32_0 = arith.constant 0 : i32
    %c0_i32_1 = arith.constant 0 : i32
    return %arg1, %c0_i32, %c0_i32_0 : i32, i32, i32
  }
  func.func @transform_9(%arg0: i32, %arg1: i32) -> (i32, i32, i32) {
    %c0_i32 = arith.constant 0 : i32
    %c0_i32_0 = arith.constant 0 : i32
    %c0_i32_1 = arith.constant 0 : i32
    return %arg1, %c0_i32, %c0_i32_0 : i32, i32, i32
  }
  func.func @transform_10(%arg0: i32, %arg1: i32) -> (i32, i32, i32) {
    %c0_i32 = arith.constant 0 : i32
    %c0_i32_0 = arith.constant 0 : i32
    %c0_i32_1 = arith.constant 0 : i32
    return %arg1, %c0_i32, %c0_i32_0 : i32, i32, i32
  }
  func.func @transform_11(%arg0: i32, %arg1: i32) -> (i32, i32, i32) {
    %c0_i32 = arith.constant 0 : i32
    %c0_i32_0 = arith.constant 0 : i32
    %c0_i32_1 = arith.constant 0 : i32
    return %arg1, %c0_i32, %c0_i32_0 : i32, i32, i32
  }
  func.func @transform_12(%arg0: i32, %arg1: i32) -> (i32, i32, i32) {
    %c0_i32 = arith.constant 0 : i32
    %c0_i32_0 = arith.constant 0 : i32
    %c0_i32_1 = arith.constant 0 : i32
    return %arg1, %c0_i32, %c0_i32_0 : i32, i32, i32
  }
  func.func @transform_13(%arg0: i32, %arg1: i32) -> (i32, i32, i32) {
    %c0_i32 = arith.constant 0 : i32
    %c0_i32_0 = arith.constant 0 : i32
    %c0_i32_1 = arith.constant 0 : i32
    return %arg1, %c0_i32, %c0_i32_0 : i32, i32, i32
  }
  func.func @transform_14(%arg0: i32, %arg1: i32) -> (i32, i32, i32) {
    %c0_i32 = arith.constant 0 : i32
    %c0_i32_0 = arith.constant 0 : i32
    %c0_i32_1 = arith.constant 0 : i32
    return %arg1, %c0_i32, %c0_i32_0 : i32, i32, i32
  }
  func.func @transform_15(%arg0: i32, %arg1: i32) -> (i32, i32) {
    %c0_i32 = arith.constant 0 : i32
    %c0_i32_0 = arith.constant 0 : i32
    return %arg0, %c0_i32 : i32, i32
  }
}

</mosaic_0001>

<bundles_post_ra>
// kernel: tpu_custom_call.1
= control target key start
LH: loop header
LB: loop body
LE: loop exit
PB: predicated region body
PF: predicated region fallthrough
CT: control target
= control target key end

     0   :  { %s3024_s0 = inlined_call_operand.hbm [shape: f32[16,32], index: 0, kind: input, shape index: {}]   ;;  %s3025_s1 = inlined_call_operand.hbm [shape: f32[2,8], index: 1, kind: input, shape index: {}]   ;;  %s3026_s2 = inlined_call_operand.hbm [shape: f32[2,32], index: 2, kind: input, shape index: {}]   ;;  %s3027_s3 = inlined_call_operand.hbm [shape: bf16[32,128], index: 3, kind: input, shape index: {}]   ;;  %s3028_s4 = inlined_call_operand.vmem [shape: f32[1,128], index: 4, kind: input, shape index: {}]   ;;  %s3029_s5 = inlined_call_operand.vmem [shape: bf16[2,32,96], index: 5, kind: input, shape index: {}]   ;;  %s3030_s6 = inlined_call_operand.hbm [shape: f32[2,1,96], index: 6, kind: input, shape index: {}]   ;;  %s3031_s7 = inlined_call_operand.vmem [shape: bf16[2,32,32], index: 7, kind: input, shape index: {}]   ;;  %s3032_s8 = inlined_call_operand.hbm [shape: f32[2,1,32], index: 8, kind: input, shape index: {}]   ;;  %s3033_s9 = inlined_call_operand.vmem [shape: f32[2,2,32], index: 9, kind: input, shape index: {}]   ;;  %s3034_s10 = inlined_call_operand.vmem [shape: bf16[2,32,64], index: 10, kind: input, shape index: {}]   ;;  %s3035_s11 = inlined_call_operand.hbm [shape: f32[2,1,64], index: 11, kind: input, shape index: {}]   ;;  %s3036_s12 = inlined_call_operand.vmem [shape: bf16[2,64,32], index: 12, kind: input, shape index: {}]   ;;  %s3037_s13 = inlined_call_operand.vmem [shape: f32[2,1,32], index: 13, kind: input, shape index: {}]   ;;  %s3038_s14 = inlined_call_operand.vmem [shape: f32[2,2,32], index: 14, kind: input, shape index: {}]   ;;  %s3039_s15 = inlined_call_operand.hbm [shape: f32[2,128], index: 15, kind: output, shape index: {}]  }
   0x1   :  { %3043 = sst [smem:[#allocation23_spill]] %s3024_s0 }
   0x2   :  { %3044 = sst [smem:[#allocation24_spill]] %s3025_s1 }
   0x3   :  { %3045 = sst [smem:[#allocation25_spill]] %s3026_s2 }
   0x4   :  { %3046 = sst [smem:[#allocation26_spill]] %s3027_s3 }
   0x5   :  { %3047 = sst [smem:[#allocation27_spill]] %s3028_s4 }
   0x6   :  { %3048 = sst [smem:[#allocation28_spill]] %s3029_s5 }
   0x7   :  { %3049 = sst [smem:[#allocation29_spill]] %s3030_s6 }
   0x8   :  { %3050 = sst [smem:[#allocation30_spill]] %s3031_s7 }
   0x9   :  { %3051 = sst [smem:[#allocation31_spill]] %s3032_s8 }
   0xa   :  { %3052 = sst [smem:[#allocation32_spill]] %s3033_s9 }
   0xb   :  { %3053 = sst [smem:[#allocation33_spill]] %s3034_s10 }
   0xc   :  { %3054 = sst [smem:[#allocation34_spill]] %s3035_s11 }
   0xd   :  { %3055 = sst [smem:[#allocation35_spill]] %s3036_s12 }
   0xe   :  { %3056 = sst [smem:[#allocation36_spill]] %s3037_s13 }
   0xf   :  { %3057 = sst [smem:[#allocation37_spill]] %s3038_s14 }
  0x10   :  { %3058 = sst [smem:[#allocation38_spill]] %s3039_s15 }
  0x11   :  { %20 = vsyncpa [#allocation4], 0 }
  0x12   :  { %21 = vsyncpa [#allocation7], 0 }
  0x13   :  { %22 = vsyncpa [#allocation10], 0 }
  0x14   :  { %23 = vsyncpa [#allocation5], 0  ;;  %s2645_s18 = smov 0   ;;  %s2647_s19 = smov 0  }
  0x15   :  { %s2649_s20 = smov 0   ;;  %s2651_s21 = smov 0  }
  0x16   :  { %s2653_s22 = smov 0   ;;  %s2655_s23 = smov 0  }
  0x17 LB: > { %3059 = sst [smem:[#allocation20_spill]] %s2534_s22  ;;  %s2674_s24 = sadd.s32 4294967295, %s2538_s23   ;;  %s2538_s23 = sphi %s2655_s23, %s29_s23   ;;  %s2534_s22 = sphi %s2653_s22, %s3087_s22   ;;  %s2530_s21 = sphi %s2651_s21, %s3086_s21   ;;  %s2526_s20 = sphi %s2649_s20, %s3090_s20   ;;  %s2522_s19 = sphi %s2647_s19, %s3089_s19   ;;  %s2518_s18 = sphi %s2645_s18, %s3088_s18  }
  0x18   : > { %3060 = sst [smem:[#allocation21_spill]] %s2538_s23  ;;  %p202_p0 = scmp.ne.s32.totalorder %s2522_s19, %s2518_s18 }
  0x19   : > { %p203_p1 = scmp.eq.s32.totalorder %s2674_s24, 0  ;;  %p1915_p2 = scmp.ge.s32.totalorder %s2538_s23, 1 }
  0x1a   : > { %p447_p3 = scmp.lt.s32.totalorder %s2538_s23, 3  ;;  %s3062_s0 = sld [smem:[#allocation23_spill]] }
  0x1b   : > { %p2682_p4 = por %p203_p1, %p202_p0  ;;  %s2540_s30 = smov [#allocation3]  }
  0x1c   : > { %p2689_p5 = pnand %p1915_p2, %p447_p3  ;;  %s463_s16 = sshll.u32 %s2540_s30, 4  ;;  %s464_s16 = int_to_ptr.vmem [resolvable:$true] %s463_s16 }
  0x1d   : > { %s2541_s18 = smov 128   ;;  %s2542_s26 = smov 8  }
  0x1e   : > { %p2053_p6 = pneg %p2689_p5  ;;  %s38_s27 = sadd.s32 1, %s2534_s22 }
  0x1f   : > { %p39_p8 = scmp.ge.s32.totalorder %s38_s27, 2  ;;  %p196_p9 = scmp.ne.s32.totalorder %s2526_s20, %s2522_s19 }
  0x20   : > { %s461_s28 = sshll.u32 %s3062_s0, 4  ;;  %p2697_p7 = pnand %p2053_p6, %p203_p1  ;;  %s462_s28 = int_to_ptr.hbm [resolvable:$true] %s461_s28 }
  0x21   : > { %s189_s0 = sadd.s32 1, %s2526_s20  ;;  %p197_p10 = scmp.eq.s32.totalorder %s2538_s23, 0 }
  0x22   : > { %2056 = dma.hbm_to_vmem [thread:$0]  (!%p2697_p7), %s462_s28, 256, %s464_s16, [#allocation4], %s2541_s18, %s2541_s18, %s2542_s26  }
  0x23   : > { %s3092_s27 = smov (%p39_p8, %s38_s27), 0  ;;  %p2710_p11 = por %p197_p10, %p196_p9 }
  0x24   : > { %3065 = sst [smem:[#allocation22_spill]] %s3092_s27  ;;  %p2080_p12 = scmp.lt.s32.totalorder %s2538_s23, 2 }
  0x25   : > { %s186_s15 = ssub.s32 %s2534_s22, %s3092_s27  ;;  %s528_s4 = sand.u32 1, %s2538_s23  }
  0x26   : > { %p187_p13 = scmp.eq.s32.totalorder %s186_s15, 0  ;;  %s2719_s14 = sand.u32 1, %s2526_s20  }
  0x27   : > { %s3067_s6 = sld [smem:[#allocation29_spill]]  ;;  %s531_s13 = scalar_lea.vmem [#allocation11], %s2719_s14 }
  0x28   : > { %s2726_s26 = scalar_select %p187_p13, %s2526_s20, %s189_s0  }
  0x29   : > { %s538_s10 = sshll.u32 %s531_s13, 4  ;;  %p2731_p0 = pnand %p2080_p12, %p2710_p11  ;;  %s539_s10 = int_to_ptr.vmem [resolvable:$true] %s538_s10 }
  0x2a   : > { %s3069_s1 = sld [smem:[#allocation24_spill]]  ;;  %s2738_s0 = scalar_lea.sflag [#allocation4], %s528_s4 }
  0x2b   : > { %s2543_s13 = smov [#allocation6]   ;;  %s3070_s8 = sld [smem:[#allocation31_spill]] }
  0x2c   : > { %s480_s16 = sshll.u32 %s2543_s13, 4  ;;  %s556_s27 = scalar_lea.vmem [#allocation12], %s2719_s14  ;;  %s481_s16 = int_to_ptr.vmem [resolvable:$true] %s480_s16 }
  0x2d   : > { %s534_s18 = scalar_lea.hbm %s3067_s6, %s2534_s22  ;;  %s3071_s2 = sld [smem:[#allocation25_spill]] }
  0x2e   : > { %s536_s12 = sshll.u32 %s534_s18, 4  ;;  %s2544_s13 = smov [#allocation8]   ;;  %s537_s12 = int_to_ptr.hbm [resolvable:$true] %s536_s12 }
  0x2f   : > { %2069 = dma.hbm_to_vmem [thread:$0]  (!%p2731_p0), %s537_s12, 16, %s539_s10, %s2738_s0  }
  0x30   : > { %s478_s28 = sshll.u32 %s3069_s1, 4  ;;  %s563_s1 = sshll.u32 %s556_s27, 4  ;;  %s479_s28 = int_to_ptr.hbm [resolvable:$true] %s478_s28  ;;  %s564_s1 = int_to_ptr.vmem [resolvable:$true] %s563_s1 }
  0x31   : > { %s559_s6 = scalar_lea.hbm %s3070_s8, %s2534_s22  ;;  %s492_s30 = sshll.u32 %s2544_s13, 4  ;;  %s493_s30 = int_to_ptr.vmem [resolvable:$true] %s492_s30 }
  0x32   : > { %2059 = dma.hbm_to_vmem [thread:$0]  (!%p2697_p7), %s479_s28, 32, %s481_s16, [#allocation7]  }
  0x33   : > { %s561_s23 = sshll.u32 %s559_s6, 4  ;;  %s490_s12 = sshll.u32 %s3071_s2, 4  ;;  %s562_s23 = int_to_ptr.hbm [resolvable:$true] %s561_s23  ;;  %s491_s12 = int_to_ptr.hbm [resolvable:$true] %s490_s12 }
  0x34   : > { %2072 = dma.hbm_to_vmem [thread:$0]  (!%p2731_p0), %s562_s23, 16, %s564_s1, %s2738_s0  }
  0x35   : > { %s3072_s3 = sld [smem:[#allocation26_spill]]  ;;  %s2545_s16 = smov [#allocation9]  }
  0x36   : > { %2062 = dma.hbm_to_vmem [thread:$0]  (!%p2697_p7), %s491_s12, 32, %s493_s30, [#allocation7]  }
  0x37   : > { %s503_s1 = sshll.u32 %s2545_s16, 4  ;;  %s2546_s23 = smov 64   ;;  %s504_s1 = int_to_ptr.vmem [resolvable:$true] %s503_s1 }
  0x38   : > { %s2547_s27 = smov 4   ;;  %s3073_s11 = sld [smem:[#allocation34_spill]] }
  0x39   : > { %s588_s8 = scalar_lea.vmem [#allocation13], %s2719_s14 }
  0x3a   : > { %s595_s18 = sshll.u32 %s588_s8, 4  ;;  %s596_s18 = int_to_ptr.vmem [resolvable:$true] %s595_s18 }
  0x3b   : > { %s501_s6 = sshll.u32 %s3072_s3, 4  ;;  %s502_s6 = int_to_ptr.hbm [resolvable:$true] %s501_s6 }
  0x3c   : > { %2065 = dma.hbm_to_vmem [thread:$0]  (!%p2697_p7), %s502_s6, 256, %s504_s1, [#allocation10], %s2546_s23, %s2546_s23, %s2547_s27  }
  0x3d   : > { %625 = sbr.rel (%p2689_p5) target bundleno = 2385 (0x951), region = 80 }
  0x3e   : > { %s591_s13 = scalar_lea.hbm %s3073_s11, %s2534_s22 }
  0x3f   : > { %s593_s2 = sshll.u32 %s591_s13, 4  ;;  %s594_s2 = int_to_ptr.hbm [resolvable:$true] %s593_s2 }
  0x40   : > { %2075 = dma.hbm_to_vmem [thread:$0]  (!%p2731_p0), %s594_s2, 16, %s596_s18, %s2738_s0  }
  0x42   : > { %2497 = dma.done.wait (%p203_p1), [#allocation4], 256  }
  0x43   : > { %2499 = vsyncadd (%p203_p1), [#allocation4], 4294967040 }
  0x44   : > { %2501 = dma.done.wait (%p203_p1), [#allocation7], 64  }
  0x45   : > { %2503 = vsyncadd (%p203_p1), [#allocation7], 4294967232 }
  0x46   : > { %2505 = dma.done.wait (%p203_p1), [#allocation10], 256  }
  0x47   : > { %2507 = vsyncadd (%p203_p1), [#allocation10], 4294967040  ;;  %s647_s2 = sand.u32 1, %s2674_s24   ;;  %s2787_s8 = sand.u32 1, %s2522_s19  }
  0x48   : > { %s648_s14 = scalar_lea.sflag [#allocation4], %s647_s2 }
  0x49   : > { %2509 = dma.done.wait (%p2682_p4), %s648_s14, 48  }
  0x4a   : > { %2511 = vsyncadd (%p2682_p4), %s648_s14, 4294967248  ;;  %p750_p2 = scmp.lt.s32.totalorder %s2530_s21, 1  ;;  %s3074_s5 = sld [smem:[#allocation28_spill]] }
  0x4b   : > { %s3075_s7 = sld [smem:[#allocation30_spill]]  ;;  %s668_s22 = scalar_lea.vmem [#allocation13], %s2787_s8 }
  0x4c   : > { %s2796_s17 = scalar_select %p750_p2, %s2530_s21, 1 }
  0x4d   : > { %s3076_s9 = sld [smem:[#allocation32_spill]]  ;;  %p1936_p1 = scmp.ne.s32.totalorder %s2530_s21, 0 }
  0x4e   : > { %s2011_s15 = sshll.u32 %s2796_s17, 4  ;;  %s1930_s0 = sshll.u32 %s2796_s17, 1 }
  0x4f   : > { %s3077_s13 = sld [smem:[#allocation33_spill]]  ;;  %s2014_s2 = sshll.u32 %s2796_s17, 5 }
  0x50   : > { %s2803_s28 = scalar_lea.vmem %s3074_s5, %s2011_s15  ;;  %s3078_s30 = sld [smem:[#allocation36_spill]] }
  0x51   : > { %s2808_s16 = scalar_lea.vmem %s3075_s7, %s2011_s15  ;;  %s3079_s25 = sld [smem:[#allocation35_spill]] }
  0x52   : > { %s3080_s1 = sld [smem:[#allocation37_spill]] }
  0x53   : > { %s2813_s27 = scalar_lea.vmem %s3076_s9, %s1930_s0  ;;  %s659_s9 = scalar_lea.vmem [#allocation12], %s2787_s8 }
  0x54   : > { %785 = sbr.rel (%p1936_p1) target bundleno = 367 (0x16f), region = 112 }
  0x55   : > { %s2818_s18 = scalar_lea.vmem %s3077_s13, %s2011_s15 }
  0x56   : > { %s776_s29 = scalar_lea.vmem %s3078_s30, %s2796_s17 }
  0x57   : > { %s2828_s6 = scalar_lea.vmem %s3079_s25, %s2014_s2 }
  0x58   : > { %s2833_s23 = scalar_lea.vmem %s3080_s1, %s1930_s0 }
  0x59   : > { %v786_v0 = vld [vmem:[#allocation3] sm:$0xff]  ;;  %vm790_vm0 = vcmask 261120   ;;  %v787_v2 = vld [vmem:[#allocation3 + $0x8] sm:$0xff]  ;;  %v2548_v4 = vmov 32.0   ;;  %v2160_v35 = vld [vmem:[#allocation8] ss:$0 sm:$0xff] }
  0x5a   : > { %v791_v1 = vsel %vm790_vm0, %v786_v0, 0.0  ;;  %v794_v3 = vsel %vm790_vm0, %v787_v2, 0.0  ;;  %2162 = vrcp.f32 %v2548_v4  ;;  %v2161_v38 = vld [vmem:[#allocation8 + $0x1] ss:$0 sm:$0xff] }
  0x5b   : > { %792 = vadd.xlane.f32.xlu0 %v791_v1 }
  0x60   : > { %v2163_v5 = vpop.eup %2162 }
  0x61   : > { %v798_v6 = vmul.f32 32.0, %v2163_v5  ;;  %vm802_vm1 = vweird.f32 %v2163_v5 }
  0x63   : > { %795 = vadd.xlane.f32.xlu0 %v794_v3  ;;  %v799_v7 = vsub.f32 1.0, %v798_v6 }
  0x65   : > { %v800_v8 = vmul.f32 %v2163_v5, %v799_v7 }
  0x67   : > { %v801_v9 = vadd.f32 %v2163_v5, %v800_v8 }
  0x69   : > { %v803_v10 = vsel %vm802_vm1, %v2163_v5, %v801_v9 }
  0xce   : > { %v793_v11 = vpop.xlane.xlu0 %792 }
  0xcf   : > { %v804_v12 = vmul.f32 %v803_v10, %v793_v11 }
  0xd1   : > { %v806_v13 = vsub.f32 %v786_v0, %v804_v12 }
  0xd3   : > { %v808_v14 = vmul.f32 %v806_v13, %v806_v13 }
  0xd5   : > { %v810_v15 = vsel %vm790_vm0, %v808_v14, 0.0 }
  0xd6   : > { %811 = vadd.xlane.f32.xlu1 %v810_v15  ;;  %v796_v16 = vpop.xlane.xlu0 %795 }
  0xd7   : > { %v805_v17 = vmul.f32 %v803_v10, %v796_v16 }
  0xd9   : > { %v807_v18 = vsub.f32 %v787_v2, %v805_v17 }
  0xdb   : > { %v809_v19 = vmul.f32 %v807_v18, %v807_v18 }
  0xdd   : > { %v813_v20 = vsel %vm790_vm0, %v809_v19, 0.0 }
  0xde   : > { %814 = vadd.xlane.f32.xlu1 %v813_v20 }
 0x149   : > { %v812_v21 = vpop.xlane.xlu1 %811 }
 0x14a   : > { %v816_v22 = vmul.f32 %v812_v21, %v803_v10 }
 0x14c   : > { %v818_v23 = vadd.f32 1e-12, %v816_v22 }
 0x14e   : > { %2164 = vrsqrt.f32 %v818_v23  ;;  %vm826_vm3 = vweird.f32 %v818_v23 }
 0x151   : > { %v815_v24 = vpop.xlane.xlu1 %814 }
 0x152   : > { %v817_v25 = vmul.f32 %v815_v24, %v803_v10 }
 0x154   : > { %v2165_v26 = vpop.eup %2164  ;;  %v819_v27 = vadd.f32 1e-12, %v817_v25 }
 0x155   : > { %v821_v28 = vmul.f32 %v2165_v26, %v818_v23  ;;  %vm827_vm2 = vweird.f32 %v2165_v26 }
 0x156   : > { %2166 = vrsqrt.f32 %v819_v27  ;;  %vm828_vm4 = vmor %vm826_vm3, %vm827_vm2  ;;  %vm836_vm6 = vweird.f32 %v819_v27 }
 0x157   : > { %v822_v29 = vmul.f32 %v2165_v26, %v821_v28 }
 0x159   : > { %v823_v30 = vmul.f32 0.5, %v822_v29 }
 0x15b   : > { %v824_v31 = vsub.f32 1.5, %v823_v30 }
 0x15c   : > { %v2167_v32 = vpop.eup %2166 }
 0x15d   : > { %v825_v33 = vmul.f32 %v2165_v26, %v824_v31  ;;  %v831_v34 = vmul.f32 %v2167_v32, %v819_v27  ;;  %vm837_vm5 = vweird.f32 %v2167_v32 }
 0x15e   : > { %vm838_vm7 = vmor %vm836_vm6, %vm837_vm5 }
 0x15f   : > { %v829_v36 = vsel %vm828_vm4, %v2165_v26, %v825_v33  ;;  %v832_v37 = vmul.f32 %v2167_v32, %v831_v34 }
 0x160   : > { %v840_v39 = vmul.f32 %v829_v36, %v806_v13 }
 0x161   : > { %v833_v40 = vmul.f32 0.5, %v832_v37 }
 0x162   : > { %v843_v41 = vmul.f32 %v2160_v35, %v840_v39 }
 0x163   : > { %v834_v42 = vsub.f32 1.5, %v833_v40 }
 0x164   : > { %v846_v43 = vadd.f32 %v2161_v38, %v843_v41 }
 0x165   : > { %v835_v44 = vmul.f32 %v2167_v32, %v834_v42 }
 0x166   : > { %848 = vst.msk [vmem:[#allocation2] sm:$0xff] %vm790_vm0, %v846_v43 }
 0x167   : > { %v839_v45 = vsel %vm838_vm7, %v2167_v32, %v835_v44 }
 0x168   : > { %v841_v46 = vmul.f32 %v839_v45, %v807_v18 }
 0x16a   : > { %v844_v47 = vmul.f32 %v2160_v35, %v841_v46 }
 0x16c   : > { %v847_v48 = vadd.f32 %v2161_v38, %v844_v47 }
 0x16e   : > { %849 = vst.msk [vmem:[#allocation2 + $0x8] sm:$0xff] %vm790_vm0, %v847_v48 }
 0x16f PF: > { %v2016_v49 = vld [vmem:[%s2803_s28 + $0x8] sm:$0xff]  ;;  %v2015_v50 = vld [vmem:[%s2803_s28] sm:$0xff]  ;;  %vm873_vm8 = vcmask 261120   ;;  %s3081_s3 = scalar_lea.vmem [#allocation11], %s2787_s8  ;;  %s2549_s5 = smov 104   ;;  %vm900_vm9 = vcmask 64512  }
 0x170   : > { %v2846_v51 = vld [vmem:[#allocation2] sm:$0xff]  ;;  %883 = vmatpush.bf16.msra.mxu0 %v2016_v49  ;;  %s2550_s7 = smov 120   ;;  %s2551_s11 = smov 96   ;;  %vm935_vm10 = vcmask 1043456   ;;  %vm1135_vm11 = vcmask 130048   ;;  %vm1137_vm12 = vcmask 195584  }
 0x171   : > { %v2183_v54 = vld [vmem:[%s3081_s3] ss:$0 sm:$0xff]  ;;  %s2552_s15 = smov 80   ;;  %s2553_s0 = smov 72   ;;  %vm1571_vm4 = vcmask 523264  }
 0x172   : > { %s2554_s28 = smov 88   ;;  %s2555_s4 = smov 112   ;;  %v893_v29 = vld [vmem:[#allocation6] sm:$0x3] }
 0x173   : > { %s2556_s10 = smov 48   ;;  %s2557_s13 = smov 64   ;;  %v894_v30 = vperm.slane %v893_v29, 0  ;;  %v1139_v48 = vperm.slane %v893_v29, 1 }
 0x174   : > { %884 = vmatpush.bf16.msra.mxu0 %v2015_v50  ;;  %s2558_s2 = smov 56   ;;  %s2559_s14 = smov 40  }
 0x175   : > { %v2848_v52 = vld [vmem:[#allocation2 + $0x8] sm:$0xff]  ;;  %s2560_s12 = smov 8   ;;  %s2561_s30 = smov 24  }
 0x176   : > { %v856_v53 = vpack.c.bf16 %v2848_v52, %v2846_v51  ;;  %s2562_s25 = smov 16   ;;  %p1997_p3 = scmp.ne.s32.totalorder %s2530_s21, 1 }
 0x178   : > { %1945 = vmatmul.msk.bf16.vlgmr.msra.gmra.mxu0 %vm873_vm8, %v856_v53 }
 0x1f5   : > { %v886_v55 = vpop.f32.mrf.mxu0 }
 0x1f6   : > { %v887_v56 = vadd.f32 %v2183_v54, %v886_v55 }
 0x1f8   : > { %v891_v57 = vpack.c.bf16 %v887_v56, %v887_v56 }
 0x1fa   : > { %v896_v58 = vunpack.c.l.b16 %v891_v57 }
 0x1fc   : > { %v2855_v59 = vpack.c.b16 %v896_v58, %v896_v58 }
 0x1fd   : > { %v888_v60 = vpop.f32.mrf.mxu0 }
 0x1fe   : > { %1066 = vrot.lane.b32.xlu2 %v2855_v59, %s2549_s5  ;;  %954 = vrot.lane.b32.xlu1 %v2855_v59, %s2550_s7  ;;  %v889_v61 = vadd.f32 %v2183_v54, %v888_v60 }
 0x1ff   : > { %898 = vrot.lane.b32.xlu0 %v2855_v59, %s2551_s11 }
 0x200   : > { %v892_v62 = vpack.c.bf16 %v889_v61, %v889_v61 }
 0x202   : > { %v1141_v63 = vunpack.c.l.b16 %v892_v62 }
 0x204   : > { %v2863_v0 = vpack.c.b16 %v1141_v63, %v1141_v63 }
 0x206   : > { %1012 = vrot.lane.b32.xlu2 %v2855_v59, %s2552_s15  ;;  %1068 = vrot.lane.b32.xlu1 %v2855_v59, %s2553_s0 }
 0x207   : > { %956 = vrot.lane.b32.xlu0 %v2855_v59, %s2554_s28 }
 0x20e   : > { %1197 = vrot.lane.b32.xlu2 %v2863_v0, %s2550_s7  ;;  %1010 = vrot.lane.b32.xlu1 %v2855_v59, %s2555_s4 }
 0x20f   : > { %1199 = vrot.lane.b32.xlu0 %v2863_v0, %s2554_s28 }
 0x216   : > { %1309 = vrot.lane.b32.xlu2 %v2863_v0, %s2549_s5  ;;  %1311 = vrot.lane.b32.xlu1 %v2863_v0, %s2553_s0 }
 0x217   : > { %1143 = vrot.lane.b32.xlu0 %v2863_v0, %s2551_s11 }
 0x21e   : > { %1253 = vrot.lane.b32.xlu1 %v2863_v0, %s2555_s4 }
 0x21f   : > { %1255 = vrot.lane.b32.xlu0 %v2863_v0, %s2552_s15 }
 0x226   : > { %1043 = vrot.lane.b32.xlu1 %v2855_v59, %s2556_s10 }
 0x227   : > { %930 = vrot.lane.b32.xlu0 %v2855_v59, %s2557_s13 }
 0x22f   : > { %987 = vrot.lane.b32.xlu0 %v2855_v59, %s2558_s2 }
 0x258   : > { %v1067_v1 = vpop.permute.xlu2 %1066 }
 0x260   : > { %v1013_v2 = vpop.permute.xlu2 %1012 }
 0x261   : > { %v1018_v3 = vsel %vm900_vm9, %v1013_v2, 0 }
 0x262   : > { %1027 = vmatpush.bf16.xpose.msrb.mxu0 %v1018_v3 }
 0x268   : > { %v1198_v25 = vpop.permute.xlu2 %1197 }
 0x270   : > { %v955_v4 = vpop.permute.xlu1 %954  ;;  %v1310_v28 = vpop.permute.xlu2 %1309 }
 0x271   : > { %v899_v5 = vpop.permute.xlu0 %898 }
 0x272   : > { %v905_v6 = vsel %vm900_vm9, %v899_v5, 0 }
 0x273   : > { %914 = vmatpush.bf16.xpose.msra.mxu1 %v905_v6 }
 0x278   : > { %v1069_v7 = vpop.permute.xlu1 %1068 }
 0x279   : > { %v957_v8 = vpop.permute.xlu0 %956  ;;  %v1074_v9 = vsel %vm900_vm9, %v1069_v7, 0 }
 0x27a   : > { %1946 = vmatmul.msk.bf16.vlgmr.msra.gmra.mxu1 %vm900_vm9, %v891_v57  ;;  %v962_v10 = vsel %vm900_vm9, %v957_v8, 0 }
 0x27b   : > { %971 = vmatpush.bf16.xpose.msra.mxu3 %v962_v10 }
 0x280   : > { %v1011_v11 = vpop.permute.xlu1 %1010 }
 0x281   : > { %v1200_v12 = vpop.permute.xlu0 %1199  ;;  %1950 = vmatmul.msk.bf16.vlgmr.msrb.gmra.mxu0 %vm900_vm9, %v1011_v11 }
 0x282   : > { %v1205_v13 = vsel %vm900_vm9, %v1200_v12, 0  ;;  %1948 = vmatmul.msk.bf16.vlgmr.msra.gmra.mxu3 %vm900_vm9, %v955_v4 }
 0x283   : > { %1083 = vmatpush.bf16.xpose.msrb.mxu3 %v1074_v9 }
 0x288   : > { %v1312_v14 = vpop.permute.xlu1 %1311 }
 0x289   : > { %v1144_v15 = vpop.permute.xlu0 %1143  ;;  %v1317_v19 = vsel %vm900_vm9, %v1312_v14, 0 }
 0x28a   : > { %v1149_v16 = vsel %vm900_vm9, %v1144_v15, 0 }
 0x28b   : > { %1214 = vmatpush.bf16.xpose.msra.mxu3 %v1205_v13  ;;  %1158 = vmatpush.bf16.xpose.msra.mxu0 %v1149_v16 }
 0x290   : > { %v1254_v17 = vpop.permute.xlu1 %1253 }
 0x291   : > { %v1256_v18 = vpop.permute.xlu0 %1255 }
 0x292   : > { %v1261_v20 = vsel %vm900_vm9, %v1256_v18, 0  ;;  %1952 = vmatmul.msk.bf16.vlgmr.msrb.gmra.mxu3 %vm900_vm9, %v1067_v1  ;;  %1954 = vmatmul.msk.bf16.vlgmr.msra.gmra.mxu0 %vm900_vm9, %v892_v62 }
 0x293   : > { %1326 = vmatpush.bf16.xpose.msrb.mxu3 %v1317_v19  ;;  %1270 = vmatpush.bf16.xpose.msrb.mxu0 %v1261_v20 }
 0x298   : > { %v1044_v21 = vpop.permute.xlu1 %1043 }
 0x299   : > { %v931_v22 = vpop.permute.xlu0 %930  ;;  %v1049_v23 = vsel %vm935_vm10, %v1044_v21, 0 }
 0x29a   : > { %v937_v24 = vsel %vm935_vm10, %v931_v22, 0  ;;  %1058 = vmatpush.bf16.msrb.mxu1 %v1049_v23 }
 0x29b   : > { %946 = vmatpush.bf16.msra.mxu2 %v937_v24 }
 0x2a1   : > { %v988_v26 = vpop.permute.xlu0 %987 }
 0x2a2   : > { %1956 = vmatmul.msk.bf16.vlgmr.msra.gmra.mxu3 %vm900_vm9, %v1198_v25  ;;  %1958 = vmatmul.msk.bf16.vlgmr.msrb.gmra.mxu0 %vm900_vm9, %v1254_v17  ;;  %v993_v27 = vsel %vm935_vm10, %v988_v26, 0 }
 0x2a3   : > { %1002 = vmatpush.bf16.msrb.mxu2 %v993_v27 }
 0x2b2   : > { %1960 = vmatmul.msk.bf16.vlgmr.msrb.gmra.mxu3 %vm900_vm9, %v1310_v28 }
 0x2f7   : > { %v916_v31 = vpop.f32.mrf.mxu1 }
 0x2f8   : > { %v917_v32 = vadd.f32 %v916_v31, %v894_v30 }
 0x2fa   : > { %v920_v33 = vsel %vm900_vm9, %v917_v32, -inf }
 0x2fb   : > { %921 = vmax.xlane.f32.xlu2 %v920_v33 }
 0x2fe   : > { %v1029_v34 = vpop.f32.mrf.mxu0 }
 0x2ff   : > { %v918_v35 = vpop.f32.mrf.mxu1  ;;  %v1030_v57 = vadd.f32 %v1029_v34, %v894_v30 }
 0x301   : > { %v1033_v58 = vsel %vm900_vm9, %v1030_v57, -inf }
 0x305   : > { %v973_v36 = vpop.f32.mrf.mxu3 }
 0x306   : > { %v974_v37 = vadd.f32 %v973_v36, %v894_v30  ;;  %v1031_v38 = vpop.f32.mrf.mxu0 }
 0x308   : > { %v977_v39 = vsel %vm900_vm9, %v974_v37, -inf }
 0x309   : > { %978 = vmax.xlane.f32.xlu1 %v977_v39 }
 0x30d   : > { %v975_v40 = vpop.f32.mrf.mxu3 }
 0x30f   : > { %v1160_v41 = vpop.f32.mrf.mxu0 }
 0x310   : > { %v2908_v60 = vadd.f32 %v1160_v41, %v1139_v48 }
 0x312   : > { %v1164_v61 = vsel %vm900_vm9, %v2908_v60, -inf }
 0x313   : > { %1099 = vrot.lane.b32.xlu2 %v2855_v59, %s2559_s14 }
 0x315   : > { %v1085_v42 = vpop.f32.mrf.mxu3 }
 0x316   : > { %v1086_v43 = vadd.f32 %v1085_v42, %v894_v30 }
 0x317   : > { %v1162_v44 = vpop.f32.mrf.mxu0 }
 0x318   : > { %v1089_v45 = vsel %vm900_vm9, %v1086_v43, -inf }
 0x319   : > { %1090 = vmax.xlane.f32.xlu0 %v1089_v45 }
 0x31d   : > { %v1087_v46 = vpop.f32.mrf.mxu3 }
 0x31f   : > { %v1272_v47 = vpop.f32.mrf.mxu0 }
 0x320   : > { %v2917_v1 = vadd.f32 %v1272_v47, %v1139_v48 }
 0x322   : > { %1174 = vrot.lane.b32.xlu1 %v2863_v0, %s2557_s13  ;;  %v1276_v2 = vsel %vm900_vm9, %v2917_v1, -inf }
 0x325   : > { %v1216_v49 = vpop.f32.mrf.mxu3 }
 0x326   : > { %v1217_v50 = vadd.f32 %v1216_v49, %v1139_v48 }
 0x327   : > { %v1274_v53 = vpop.f32.mrf.mxu0 }
 0x328   : > { %v1220_v54 = vsel %vm900_vm9, %v1217_v50, -inf }
 0x329   : > { %1221 = vmax.xlane.f32.xlu0 %v1220_v54 }
 0x32d   : > { %v1218_v55 = vpop.f32.mrf.mxu3 }
 0x335   : > { %v1328_v56 = vpop.f32.mrf.mxu3 }
 0x336   : > { %v2912_v62 = vadd.f32 %v1328_v56, %v1139_v48 }
 0x338   : > { %v1332_v63 = vsel %vm900_vm9, %v2912_v62, -inf }
 0x33c   : > { %1034 = vmax.xlane.f32.xlu2 %v1033_v58 }
 0x33d   : > { %v1330_v59 = vpop.f32.mrf.mxu3  ;;  %1230 = vrot.lane.b32.xlu0 %v2863_v0, %s2558_s2 }
 0x344   : > { %1165 = vmax.xlane.f32.xlu2 %v1164_v61 }
 0x34c   : > { %1333 = vmax.xlane.f32.xlu1 %v1332_v63 }
 0x35c   : > { %1342 = vrot.lane.b32.xlu2 %v2863_v0, %s2559_s14 }
 0x365   : > { %1286 = vrot.lane.b32.xlu1 %v2863_v0, %s2556_s10 }
 0x367   : > { %1277 = vmax.xlane.f32.xlu0 %v1276_v2 }
 0x36e   : > { %v922_v3 = vpop.xlane.xlu2 %921 }
 0x36f   : > { %v923_v4 = vsub.f32 %v917_v32, %v922_v3 }
 0x371   : > { %v924_v5 = vmul.f32 1.442695, %v923_v4 }
 0x373   : > { %2187 = vpow2.f32 %v924_v5 }
 0x376   : > { %v1100_v7 = vpop.permute.xlu2 %1099 }
 0x377   : > { %v1105_v9 = vsel %vm935_vm10, %v1100_v7, 0 }
 0x379   : > { %v2923_v6 = vpop.eup %2187 }
 0x37a   : > { %v929_v8 = vpack.c.bf16 %v2923_v6, %v2923_v6  ;;  %v926_v49 = vsel %vm900_vm9, %v2923_v6, 0.0 }
 0x37c   : > { %v979_v10 = vpop.xlane.xlu1 %978  ;;  %1947 = vmatmul.msk.bf16.vlgmr.msra.gmra.mxu2 %vm900_vm9, %v929_v8 }
 0x37d   : > { %v980_v0 = vsub.f32 %v974_v37, %v979_v10  ;;  %1114 = vmatpush.bf16.msra.mxu2 %v1105_v9 }
 0x37f   : > { %v981_v11 = vmul.f32 1.442695, %v980_v0 }
 0x381   : > { %2189 = vpow2.f32 %v981_v11 }
 0x387   : > { %v2190_v12 = vpop.eup %2189 }
 0x388   : > { %v983_v13 = vsel %vm900_vm9, %v2190_v12, 0.0  ;;  %v986_v14 = vpack.c.bf16 %v2190_v12, %v2190_v12 }
 0x389   : > { %984 = vadd.xlane.f32.xlu0 %v983_v13 }
 0x38c   : > { %1949 = vmatmul.msk.bf16.vlgmr.msrb.gmra.mxu2 %vm900_vm9, %v986_v14  ;;  %v1091_v15 = vpop.xlane.xlu0 %1090 }
 0x38d   : > { %v1092_v16 = vsub.f32 %v1086_v43, %v1091_v15 }
 0x38f   : > { %v1093_v17 = vmul.f32 1.442695, %v1092_v16 }
 0x391   : > { %2191 = vpow2.f32 %v1093_v17 }
 0x394   : > { %v1175_v18 = vpop.permute.xlu1 %1174 }
 0x395   : > { %v1180_v19 = vsel %vm935_vm10, %v1175_v18, 0 }
 0x396   : > { %1189 = vmatpush.bf16.msra.mxu1 %v1180_v19 }
 0x397   : > { %v2192_v20 = vpop.eup %2191 }
 0x398   : > { %v1098_v21 = vpack.c.bf16 %v2192_v20, %v2192_v20  ;;  %v1095_v44 = vsel %vm900_vm9, %v2192_v20, 0.0 }
 0x39c   : > { %1953 = vmatmul.msk.bf16.vlgmr.msra.gmra.mxu2 %vm900_vm9, %v1098_v21  ;;  %v1222_v22 = vpop.xlane.xlu0 %1221 }
 0x39d   : > { %v1223_v23 = vsub.f32 %v1217_v50, %v1222_v22 }
 0x39f   : > { %v1224_v24 = vmul.f32 1.442695, %v1223_v23 }
 0x3a1   : > { %2193 = vpow2.f32 %v1224_v24 }
 0x3a7   : > { %v2194_v25 = vpop.eup %2193 }
 0x3a8   : > { %v1226_v26 = vsel %vm900_vm9, %v2194_v25, 0.0  ;;  %v1229_v31 = vpack.c.bf16 %v2194_v25, %v2194_v25 }
 0x3a9   : > { %1227 = vadd.xlane.f32.xlu2 %v1226_v26 }
 0x3af   : > { %v1035_v27 = vpop.xlane.xlu2 %1034  ;;  %v1231_v28 = vpop.permute.xlu0 %1230 }
 0x3b0   : > { %v1036_v29 = vsub.f32 %v1030_v57, %v1035_v27  ;;  %v1236_v30 = vsel %vm935_vm10, %v1231_v28, 0 }
 0x3b1   : > { %1245 = vmatpush.bf16.msrb.mxu2 %v1236_v30 }
 0x3b2   : > { %v1037_v32 = vmul.f32 1.442695, %v1036_v29 }
 0x3b4   : > { %2195 = vpow2.f32 %v1037_v32  ;;  %1957 = vmatmul.msk.bf16.vlgmr.msrb.gmra.mxu2 %vm900_vm9, %v1229_v31 }
 0x3b7   : > { %v1166_v33 = vpop.xlane.xlu2 %1165 }
 0x3b8   : > { %v1167_v35 = vsub.f32 %v2908_v60, %v1166_v33 }
 0x3ba   : > { %v2196_v34 = vpop.eup %2195  ;;  %v1168_v38 = vmul.f32 1.442695, %v1167_v35 }
 0x3bb   : > { %v1039_v36 = vsel %vm900_vm9, %v2196_v34, 0.0  ;;  %v1042_v37 = vpack.c.bf16 %v2196_v34, %v2196_v34 }
 0x3bc   : > { %1040 = vadd.xlane.f32.xlu0 %v1039_v36  ;;  %2197 = vpow2.f32 %v1168_v38  ;;  %v2018_v38 = vld [vmem:[%s2808_s16 + $0x8] sm:$0xff] }
 0x3bd   : > { %1951 = vmatmul.msk.bf16.vlgmr.msrb.gmra.mxu1 %vm900_vm9, %v1042_v37  ;;  %1410 = vmatpush.bf16.msra.mxu0 %v2018_v38  ;;  %v1418_v38 = vld [vmem:[%s2813_s27] sm:$0x3] }
 0x3bf   : > { %v1334_v39 = vpop.xlane.xlu1 %1333  ;;  %v1343_v40 = vpop.permute.xlu2 %1342 }
 0x3c0   : > { %v1335_v41 = vsub.f32 %v2912_v62, %v1334_v39  ;;  %v1348_v42 = vsel %vm935_vm10, %v1343_v40, 0  ;;  %v2017_v39 = vld [vmem:[%s2808_s16] sm:$0xff]  ;;  %s3083_s16 = sld [smem:[#allocation27_spill]] (!%p1997_p3) }
 0x3c1   : > { %1357 = vmatpush.bf16.msra.mxu2 %v1348_v42  ;;  %1411 = vmatpush.bf16.msra.mxu0 %v2017_v39 }
 0x3c2   : > { %v1336_v43 = vmul.f32 1.442695, %v1335_v41  ;;  %v2198_v45 = vpop.eup %2197 }
 0x3c3   : > { %v1173_v47 = vpack.c.bf16 %v2198_v45, %v2198_v45  ;;  %v1170_v57 = vsel %vm900_vm9, %v2198_v45, 0.0 }
 0x3c4   : > { %2199 = vpow2.f32 %v1336_v43  ;;  %1096 = vadd.xlane.f32.xlu0 %v1095_v44 }
 0x3ca   : > { %v2200_v46 = vpop.eup %2199 }
 0x3cb   : > { %v1341_v48 = vpack.c.bf16 %v2200_v46, %v2200_v46  ;;  %v1338_v50 = vsel %vm900_vm9, %v2200_v46, 0.0 }
 0x3cc   : > { %927 = vadd.xlane.f32.xlu0 %v926_v49 }
 0x3cd   : > { %1955 = vmatmul.msk.bf16.vlgmr.msra.gmra.mxu1 %vm900_vm9, %v1173_v47  ;;  %1961 = vmatmul.msk.bf16.vlgmr.msra.gmra.mxu2 %vm900_vm9, %v1341_v48 }
 0x3d4   : > { %1339 = vadd.xlane.f32.xlu0 %v1338_v50 }
 0x3d7   : > { %v1287_v53 = vpop.permute.xlu1 %1286 }
 0x3d8   : > { %v1292_v54 = vsel %vm935_vm10, %v1287_v53, 0 }
 0x3d9   : > { %1301 = vmatpush.bf16.msrb.mxu1 %v1292_v54 }
 0x3da   : > { %v1278_v55 = vpop.xlane.xlu0 %1277 }
 0x3db   : > { %v1279_v56 = vsub.f32 %v2917_v1, %v1278_v55 }
 0x3dc   : > { %1171 = vadd.xlane.f32.xlu0 %v1170_v57 }
 0x3dd   : > { %v1280_v58 = vmul.f32 1.442695, %v1279_v56 }
 0x3df   : > { %2201 = vpow2.f32 %v1280_v58 }
 0x3e5   : > { %v2202_v59 = vpop.eup %2201 }
 0x3e6   : > { %v1285_v60 = vpack.c.bf16 %v2202_v59, %v2202_v59  ;;  %v1282_v61 = vsel %vm900_vm9, %v2202_v59, 0.0 }
 0x3e7   : > { %1283 = vadd.xlane.f32.xlu1 %v1282_v61  ;;  %v2184_v61 = vld [vmem:[%s659_s9] ss:$0 sm:$0xff] }
 0x3e8   : > { %1959 = vmatmul.msk.bf16.vlgmr.msrb.gmra.mxu1 %vm900_vm9, %v1285_v60 }
 0x3fc   : > { %v985_v5 = vpop.xlane.xlu0 %984 }
 0x3fd   : > { %2203 = vrcp.f32 %v985_v5 }
 0x3ff   : > { %v948_v62 = vpop.f32.mrf.mxu2 }
 0x403   : > { %v2204_v8 = vpop.eup %2203 }
 0x407   : > { %v950_v63 = vpop.f32.mrf.mxu2 }
 0x40f   : > { %v1004_v2 = vpop.f32.mrf.mxu2 }
 0x410   : > { %v1009_v11 = vmul.f32 %v2204_v8, %v1004_v2 }
 0x417   : > { %v1006_v3 = vpop.f32.mrf.mxu2 }
 0x41c   : > { %v1228_v1 = vpop.xlane.xlu2 %1227 }
 0x41d   : > { %2205 = vrcp.f32 %v1228_v1 }
 0x41f   : > { %v1116_v4 = vpop.f32.mrf.mxu2 }
 0x423   : > { %v2206_v9 = vpop.eup %2205 }
 0x427   : > { %v1118_v6 = vpop.f32.mrf.mxu2 }
 0x42f   : > { %v1041_v7 = vpop.xlane.xlu0 %1040 }
 0x437   : > { %v1247_v10 = vpop.f32.mrf.mxu2  ;;  %v1097_v0 = vpop.xlane.xlu0 %1096 }
 0x438   : > { %v1252_v12 = vmul.f32 %v2206_v9, %v1247_v10 }
 0x43a   : > { %v2168_v13 = vpack.i.bf16 %v1252_v12, %v1009_v11  ;;  %v1060_v14 = vpop.f32.mrf.mxu1 }
 0x43c   : > { %2169 = vrot.lane.b32.xlu2 %v2168_v13, %s2560_s12 }
 0x43f   : > { %v1249_v15 = vpop.f32.mrf.mxu2  ;;  %v928_v16 = vpop.xlane.xlu0 %927 }
 0x440   : > { %2207 = vrcp.f32 %v928_v16 }
 0x441   : > { %2209 = vrcp.f32 %v1097_v0 }
 0x442   : > { %v1062_v17 = vpop.f32.mrf.mxu1 }
 0x446   : > { %v2208_v18 = vpop.eup %2207 }
 0x447   : > { %v953_v19 = vmul.f32 %v2208_v18, %v948_v62  ;;  %v1340_v20 = vpop.xlane.xlu0 %1339  ;;  %v2210_v22 = vpop.eup %2209 }
 0x448   : > { %2211 = vrcp.f32 %v1340_v20  ;;  %v1121_v25 = vmul.f32 %v2210_v22, %v1116_v4 }
 0x449   : > { %2213 = vrcp.f32 %v1041_v7  ;;  %v2563_v7 = vmov 32.0  }
 0x44a   : > { %v1191_v21 = vpop.f32.mrf.mxu1 }
 0x44e   : > { %v2212_v23 = vpop.eup %2211 }
 0x44f   : > { %v2214_v31 = vpop.eup %2213  ;;  %v1172_v40 = vpop.xlane.xlu0 %1171 }
 0x450   : > { %v1359_v24 = vpop.f32.mrf.mxu2  ;;  %v1065_v34 = vmul.f32 %v2214_v31, %v1060_v14 }
 0x451   : > { %v1364_v26 = vmul.f32 %v2212_v23, %v1359_v24 }
 0x452   : > { %v1193_v27 = vpop.f32.mrf.mxu1 }
 0x453   : > { %v2178_v28 = vpack.i.bf16 %v1364_v26, %v1121_v25  ;;  %v2019_v25 = vld [vmem:[%s2818_s18] sm:$0xff] }
 0x455   : > { %2179 = vrot.lane.b32.xlu1 %v2178_v28, %s2561_s30 }
 0x458   : > { %v1361_v29 = vpop.f32.mrf.mxu2 }
 0x45a   : > { %v1284_v30 = vpop.xlane.xlu1 %1283 }
 0x45b   : > { %2215 = vrcp.f32 %v1284_v30 }
 0x45c   : > { %2217 = vrcp.f32 %v1172_v40 }
 0x45d   : > { %2219 = vrcp.f32 %v2563_v7 }
 0x461   : > { %v2216_v32 = vpop.eup %2215 }
 0x462   : > { %v2218_v42 = vpop.eup %2217 }
 0x463   : > { %v1196_v46 = vmul.f32 %v2218_v42, %v1191_v21  ;;  %v2220_v8 = vpop.eup %2219  ;;  %v2020_v21 = vld [vmem:[%s2818_s18 + $0x8] sm:$0xff]  ;;  %v1472_v42 = vperm.slane %v1418_v38, 0 }
 0x464   : > { %v1428_v9 = vmul.f32 32.0, %v2220_v8  ;;  %vm1432_vm13 = vweird.f32 %v2220_v8  ;;  %1508 = vmatpush.bf16.msra.mxu1 %v2020_v21 }
 0x465   : > { %v1303_v33 = vpop.f32.mrf.mxu1 }
 0x466   : > { %v1308_v35 = vmul.f32 %v2216_v32, %v1303_v33  ;;  %v1429_v10 = vsub.f32 1.0, %v1428_v9 }
 0x468   : > { %v2173_v36 = vpack.i.bf16 %v1308_v35, %v1065_v34  ;;  %v1430_v0 = vmul.f32 %v2220_v8, %v1429_v10  ;;  %1509 = vmatpush.bf16.msra.mxu1 %v2019_v25 }
 0x46a   : > { %2174 = vrot.lane.b32.xlu0 %v2173_v36, %s2562_s25  ;;  %v1431_v11 = vadd.f32 %v2220_v8, %v1430_v0 }
 0x46d   : > { %v1305_v37 = vpop.f32.mrf.mxu1 }
 0x496   : > { %v2170_v41 = vpop.permute.xlu2 %2169 }
 0x497   : > { %v2172_v43 = vunpack.i.h.bf16 %v2170_v41  ;;  %v2171_v44 = vunpack.i.l.bf16 %v2170_v41 }
 0x499   : > { %v1134_v50 = vsel %vm900_vm9, %v953_v19, %v2171_v44  ;;  %v1377_v53 = vsel %vm900_vm9, %v1196_v46, %v2172_v43  ;;  %v1475_v46 = vperm.slane %v1418_v38, 1 }
 0x4c7   : > { %v2180_v45 = vpop.permute.xlu1 %2179 }
 0x4c8   : > { %v2182_v54 = vunpack.i.h.bf16 %v2180_v45  ;;  %v2181_v55 = vunpack.i.l.bf16 %v2180_v45 }
 0x4dc   : > { %v2175_v47 = vpop.permute.xlu0 %2174 }
 0x4dd   : > { %v2177_v48 = vunpack.i.h.bf16 %v2175_v47  ;;  %v2176_v49 = vunpack.i.l.bf16 %v2175_v47 }
 0x4df   : > { %v1378_v56 = vsel %vm1135_vm11, %v1377_v53, %v2177_v48  ;;  %v1136_v57 = vsel %vm1135_vm11, %v1134_v50, %v2176_v49 }
 0x4e0   : > { %v1379_v58 = vsel %vm1137_vm12, %v1378_v56, %v2182_v54  ;;  %v1138_v59 = vsel %vm1137_vm12, %v1136_v57, %v2181_v55  ;;  %v2024_v55 = vld [vmem:[%s2828_s6 + $0x18] sm:$0xff]  ;;  %v2023_v56 = vld [vmem:[%s2828_s6 + $0x10] sm:$0xff]  ;;  %v2022_v57 = vld [vmem:[%s2828_s6 + $0x8] sm:$0xff] }
 0x4e1   : > { %v1384_v60 = vpack.c.bf16 %v1379_v58, %v1138_v59  ;;  %1579 = vmatpush.bf16.msra.mxu3 %v2024_v55  ;;  %v2185_v58 = vld [vmem:[%s668_s22] ss:$0 sm:$0xff] }
 0x4e3   : > { %1970 = vmatmul.msk.bf16.vlgmr.msra.gmra.mxu0 %vm873_vm8, %v1384_v60  ;;  %v2021_v60 = vld [vmem:[%s2828_s6] sm:$0xff] }
 0x4e5   : > { %1580 = vmatpush.bf16.msra.mxu3 %v2023_v56 }
 0x4e9   : > { %1581 = vmatpush.bf16.msra.mxu3 %v2022_v57 }
 0x4ed   : > { %1582 = vmatpush.bf16.msra.mxu3 %v2021_v60 }
 0x560   : > { %v1413_v62 = vpop.f32.mrf.mxu0 }
 0x561   : > { %v1414_v63 = vadd.f32 %v2184_v61, %v1413_v62 }
 0x563   : > { %v1419_v2 = vadd.f32 %v1414_v63, %v2846_v51  ;;  %v2963_v51 = vsel %vm1432_vm13, %v2220_v8, %v1431_v11 }
 0x565   : > { %v1421_v3 = vsel %vm873_vm8, %v1419_v2, 0.0 }
 0x566   : > { %1422 = vadd.xlane.f32.xlu2 %v1421_v3 }
 0x568   : > { %v1415_v4 = vpop.f32.mrf.mxu0 }
 0x569   : > { %v1416_v5 = vadd.f32 %v2184_v61, %v1415_v4 }
 0x56b   : > { %v1420_v6 = vadd.f32 %v1416_v5, %v2848_v52 }
 0x56d   : > { %v1424_v1 = vsel %vm873_vm8, %v1420_v6, 0.0 }
 0x56e   : > { %1425 = vadd.xlane.f32.xlu0 %v1424_v1 }
 0x5d9   : > { %v1423_v12 = vpop.xlane.xlu2 %1422 }
 0x5da   : > { %v1434_v13 = vmul.f32 %v2963_v51, %v1423_v12 }
 0x5dc   : > { %v1436_v14 = vsub.f32 %v1419_v2, %v1434_v13 }
 0x5de   : > { %v1438_v52 = vmul.f32 %v1436_v14, %v1436_v14 }
 0x5e0   : > { %v1440_v15 = vsel %vm873_vm8, %v1438_v52, 0.0 }
 0x5e1   : > { %v1426_v16 = vpop.xlane.xlu0 %1425  ;;  %1441 = vadd.xlane.f32.xlu1 %v1440_v15 }
 0x5e2   : > { %v1435_v17 = vmul.f32 %v2963_v51, %v1426_v16 }
 0x5e4   : > { %v1437_v18 = vsub.f32 %v1420_v6, %v1435_v17 }
 0x5e6   : > { %v1439_v19 = vmul.f32 %v1437_v18, %v1437_v18 }
 0x5e8   : > { %v1443_v20 = vsel %vm873_vm8, %v1439_v19, 0.0 }
 0x5e9   : > { %1444 = vadd.xlane.f32.xlu2 %v1443_v20 }
 0x654   : > { %v1442_v22 = vpop.xlane.xlu1 %1441 }
 0x655   : > { %v1446_v23 = vmul.f32 %v1442_v22, %v2963_v51 }
 0x657   : > { %v1448_v24 = vadd.f32 1e-12, %v1446_v23 }
 0x659   : > { %2221 = vrsqrt.f32 %v1448_v24  ;;  %vm1456_vm15 = vweird.f32 %v1448_v24 }
 0x65c   : > { %v1445_v26 = vpop.xlane.xlu2 %1444 }
 0x65d   : > { %v1447_v27 = vmul.f32 %v1445_v26, %v2963_v51 }
 0x65f   : > { %v2222_v28 = vpop.eup %2221  ;;  %v1449_v29 = vadd.f32 1e-12, %v1447_v27 }
 0x660   : > { %v1451_v30 = vmul.f32 %v2222_v28, %v1448_v24  ;;  %vm1457_vm14 = vweird.f32 %v2222_v28 }
 0x661   : > { %2223 = vrsqrt.f32 %v1449_v29  ;;  %vm1458_vm0 = vmor %vm1456_vm15, %vm1457_vm14  ;;  %vm1466_vm2 = vweird.f32 %v1449_v29 }
 0x662   : > { %v1452_v31 = vmul.f32 %v2222_v28, %v1451_v30 }
 0x664   : > { %v1453_v32 = vmul.f32 0.5, %v1452_v31 }
 0x666   : > { %v1454_v33 = vsub.f32 1.5, %v1453_v32 }
 0x667   : > { %v2224_v34 = vpop.eup %2223 }
 0x668   : > { %v1455_v35 = vmul.f32 %v2222_v28, %v1454_v33  ;;  %v1461_v36 = vmul.f32 %v2224_v34, %v1449_v29  ;;  %vm1467_vm1 = vweird.f32 %v2224_v34 }
 0x669   : > { %vm1468_vm3 = vmor %vm1466_vm2, %vm1467_vm1 }
 0x66a   : > { %v1462_v37 = vmul.f32 %v2224_v34, %v1461_v36  ;;  %v1459_v39 = vsel %vm1458_vm0, %v2222_v28, %v1455_v35 }
 0x66b   : > { %v1470_v43 = vmul.f32 %v1459_v39, %v1436_v14 }
 0x66c   : > { %v1463_v40 = vmul.f32 0.5, %v1462_v37 }
 0x66d   : > { %v1473_v47 = vmul.f32 %v1472_v42, %v1470_v43 }
 0x66e   : > { %v1464_v41 = vsub.f32 1.5, %v1463_v40 }
 0x66f   : > { %v1476_v50 = vadd.f32 %v1475_v46, %v1473_v47  ;;  %v1589_v47 = vld [vmem:[%s2833_s23] sm:$0x3] }
 0x670   : > { %v1465_v44 = vmul.f32 %v2224_v34, %v1464_v41  ;;  %v1639_v57 = vperm.slane %v1589_v47, 1 }
 0x672   : > { %v1469_v45 = vsel %vm1468_vm3, %v2224_v34, %v1465_v44 }
 0x673   : > { %v1471_v48 = vmul.f32 %v1469_v45, %v1437_v18  ;;  %v2186_v18 = vld [vmem:[%s776_s29] ss:$0 sm:$0xff] }
 0x675   : > { %v1474_v49 = vmul.f32 %v1472_v42, %v1471_v48 }
 0x677   : > { %v1477_v53 = vadd.f32 %v1475_v46, %v1474_v49 }
 0x679   : > { %v1482_v54 = vpack.c.bf16 %v1477_v53, %v1476_v50 }
 0x67b   : > { %1979 = vmatmul.msk.bf16.vlgmr.msra.gmra.mxu1 %vm873_vm8, %v1482_v54  ;;  %v1636_v54 = vperm.slane %v1589_v47, 0 }
 0x6f8   : > { %v1511_v59 = vpop.f32.mrf.mxu1 }
 0x6f9   : > { %v1512_v61 = vadd.f32 %v2185_v58, %v1511_v59 }
 0x6fb   : > { %v1516_v62 = vmul.f32 %v1512_v61, %v1512_v61 }
 0x6fd   : > { %v1518_v63 = vmul.f32 %v1516_v62, %v1512_v61 }
 0x6ff   : > { %v1520_v2 = vmul.f32 0.044715, %v1518_v63 }
 0x700   : > { %v1513_v3 = vpop.f32.mrf.mxu1 }
 0x701   : > { %v1522_v4 = vadd.f32 %v1520_v2, %v1512_v61  ;;  %v1514_v5 = vadd.f32 %v2185_v58, %v1513_v3 }
 0x703   : > { %v1524_v6 = vmul.f32 0.7978846, %v1522_v4  ;;  %v1517_v1 = vmul.f32 %v1514_v5, %v1514_v5 }
 0x705   : > { %v1519_v7 = vmul.f32 %v1517_v1, %v1514_v5  ;;  %2225 = vtanh.f32 %v1524_v6 }
 0x707   : > { %v1521_v8 = vmul.f32 0.044715, %v1519_v7 }
 0x709   : > { %v1523_v9 = vadd.f32 %v1521_v8, %v1514_v5 }
 0x70b   : > { %v1525_v10 = vmul.f32 0.7978846, %v1523_v9  ;;  %v2226_v0 = vpop.eup %2225 }
 0x70c   : > { %v1528_v11 = vadd.f32 1.0, %v2226_v0 }
 0x70d   : > { %2227 = vtanh.f32 %v1525_v10 }
 0x70e   : > { %v1530_v13 = vmul.f32 0.5, %v1528_v11 }
 0x710   : > { %v1532_v15 = vmul.f32 %v1530_v13, %v1512_v61 }
 0x713   : > { %v2228_v12 = vpop.eup %2227 }
 0x714   : > { %v1529_v14 = vadd.f32 1.0, %v2228_v12 }
 0x716   : > { %v1531_v52 = vmul.f32 0.5, %v1529_v14 }
 0x718   : > { %v1533_v16 = vmul.f32 %v1531_v52, %v1514_v5 }
 0x71a   : > { %v1542_v17 = vpack.c.bf16 %v1533_v16, %v1532_v15 }
 0x71c   : > { %1996 = vmatmul.msk.bf16.vlgmr.msra.gmra.mxu3 %vm1571_vm4, %v1542_v17 }
 0x79f   : > { %v1584_v19 = vpop.f32.mrf.mxu3 }
 0x7a0   : > { %v1585_v20 = vadd.f32 %v2186_v18, %v1584_v19 }
 0x7a2   : > { %v1590_v21 = vadd.f32 %v1585_v20, %v1476_v50 }
 0x7a4   : > { %v1592_v22 = vsel %vm873_vm8, %v1590_v21, 0.0 }
 0x7a5   : > { %1593 = vadd.xlane.f32.xlu0 %v1592_v22 }
 0x7a7   : > { %v1586_v23 = vpop.f32.mrf.mxu3 }
 0x7a8   : > { %v1587_v24 = vadd.f32 %v2186_v18, %v1586_v23 }
 0x7aa   : > { %v1591_v25 = vadd.f32 %v1587_v24, %v1477_v53 }
 0x7ac   : > { %v1595_v26 = vsel %vm873_vm8, %v1591_v25, 0.0 }
 0x7ad   : > { %1596 = vadd.xlane.f32.xlu2 %v1595_v26 }
 0x818   : > { %v1594_v27 = vpop.xlane.xlu0 %1593 }
 0x819   : > { %v1598_v28 = vmul.f32 %v1594_v27, %v2963_v51 }
 0x81b   : > { %v1600_v29 = vsub.f32 %v1590_v21, %v1598_v28 }
 0x81d   : > { %v1602_v30 = vmul.f32 %v1600_v29, %v1600_v29 }
 0x81f   : > { %v1604_v31 = vsel %vm873_vm8, %v1602_v30, 0.0 }
 0x820   : > { %v1597_v32 = vpop.xlane.xlu2 %1596  ;;  %1605 = vadd.xlane.f32.xlu0 %v1604_v31 }
 0x821   : > { %v1599_v33 = vmul.f32 %v1597_v32, %v2963_v51 }
 0x823   : > { %v1601_v34 = vsub.f32 %v1591_v25, %v1599_v33 }
 0x825   : > { %v1603_v35 = vmul.f32 %v1601_v34, %v1601_v34 }
 0x827   : > { %v1607_v36 = vsel %vm873_vm8, %v1603_v35, 0.0 }
 0x828   : > { %1608 = vadd.xlane.f32.xlu1 %v1607_v36 }
 0x893   : > { %v1606_v37 = vpop.xlane.xlu0 %1605 }
 0x894   : > { %v1610_v38 = vmul.f32 %v1606_v37, %v2963_v51 }
 0x896   : > { %v1612_v39 = vadd.f32 1e-12, %v1610_v38 }
 0x898   : > { %2229 = vrsqrt.f32 %v1612_v39  ;;  %vm1620_vm6 = vweird.f32 %v1612_v39 }
 0x89b   : > { %v1609_v40 = vpop.xlane.xlu1 %1608 }
 0x89c   : > { %v1611_v41 = vmul.f32 %v1609_v40, %v2963_v51 }
 0x89e   : > { %v2230_v42 = vpop.eup %2229  ;;  %v1613_v43 = vadd.f32 1e-12, %v1611_v41 }
 0x89f   : > { %v1615_v44 = vmul.f32 %v2230_v42, %v1612_v39  ;;  %vm1621_vm5 = vweird.f32 %v2230_v42 }
 0x8a0   : > { %2231 = vrsqrt.f32 %v1613_v43  ;;  %vm1622_vm7 = vmor %vm1620_vm6, %vm1621_vm5  ;;  %vm1630_vm10 = vweird.f32 %v1613_v43 }
 0x8a1   : > { %v1616_v45 = vmul.f32 %v2230_v42, %v1615_v44 }
 0x8a3   : > { %v1617_v46 = vmul.f32 0.5, %v1616_v45 }
 0x8a5   : > { %v1618_v48 = vsub.f32 1.5, %v1617_v46 }
 0x8a6   : > { %v2232_v49 = vpop.eup %2231 }
 0x8a7   : > { %v1619_v50 = vmul.f32 %v2230_v42, %v1618_v48  ;;  %v1625_v53 = vmul.f32 %v2232_v49, %v1613_v43  ;;  %vm1631_vm9 = vweird.f32 %v2232_v49 }
 0x8a8   : > { %vm1632_vm11 = vmor %vm1630_vm10, %vm1631_vm9 }
 0x8a9   : > { %v1623_v55 = vsel %vm1622_vm7, %v2230_v42, %v1619_v50  ;;  %v1626_v56 = vmul.f32 %v2232_v49, %v1625_v53 }
 0x8aa   : > { %v1634_v58 = vmul.f32 %v1623_v55, %v1600_v29 }
 0x8ab   : > { %v1627_v51 = vmul.f32 0.5, %v1626_v56 }
 0x8ac   : > { %v1637_v59 = vmul.f32 %v1636_v54, %v1634_v58 }
 0x8ad   : > { %v1628_v60 = vsub.f32 1.5, %v1627_v51 }
 0x8ae   : > { %v1640_v61 = vadd.f32 %v1639_v57, %v1637_v59 }
 0x8af   : > { %v1629_v62 = vmul.f32 %v2232_v49, %v1628_v60 }
 0x8b0   : > { %1642 = vst.msk [vmem:[#allocation2] sm:$0xff] %vm873_vm8, %v1640_v61 }
 0x8b1   : > { %v1633_v63 = vsel %vm1632_vm11, %v2232_v49, %v1629_v62 }
 0x8b2   : > { %v1635_v2 = vmul.f32 %v1633_v63, %v1601_v34 }
 0x8b4   : > { %v1638_v3 = vmul.f32 %v1636_v54, %v1635_v2  ;;  %1647 = sbr.rel (%p1997_p3) target bundleno = 2375 (0x947), region = 116 }
 0x8b6   : > { %v1641_v4 = vadd.f32 %v1639_v57, %v1638_v3 }
 0x8b8   : > { %1643 = vst.msk [vmem:[#allocation2 + $0x8] sm:$0xff] %vm873_vm8, %v1641_v4 }
 0x8b9   : > { %v2026_v5 = vld [vmem:[#allocation9 + $0x8] sm:$0xff]  ;;  %v1649_v6 = vrot.slane %v1641_v4, 7  ;;  %vm1651_vm12 = vcmask 1040384   ;;  %v2025_v1 = vld [vmem:[#allocation9] sm:$0xff]  ;;  %v2233_v9 = vld [vmem:[%s3083_s16] ss:$0 sm:$0xff] }
 0x8ba   : > { %1683 = vmatpush.bf16.msra.mxu0 %v2026_v5 }
 0x8bb   : > { %v1652_v7 = vsel %vm1651_vm12, %v1640_v61, %v1649_v6 }
 0x8bc   : > { %v1657_v8 = vpack.c.bf16 %v1652_v7, %v1652_v7 }
 0x8be   : > { %1684 = vmatpush.bf16.msra.mxu0 %v2025_v1 }
 0x8c1   : > { %2006 = vmatmul.msk.bf16.vlgmr.msra.gmra.mxu0 %vm873_vm8, %v1657_v8 }
 0x93e   : > { %v1686_v10 = vpop.f32.mrf.mxu0 }
 0x93f   : > { %v1687_v0 = vadd.f32 %v2233_v9, %v1686_v10 }
 0x941   : > { %1690 = vst [vmem:[#allocation14] sm:$0x3] %v1687_v0 }
 0x946   : > { %v1688_v11 = vpop.f32.mrf.mxu0 }
 0x947 PF: > { %p2085_p4 = scmp.eq.s32.totalorder %s2674_s24, 1  ;;  %s3084_s18 = sld [smem:[#allocation38_spill]] }
 0x948   : > { %s2564_s1 = smov [#allocation14]  }
 0x949   : > { %s1699_s23 = sshll.u32 %s2564_s1, 4  ;;  %s1700_s23 = int_to_ptr.vmem [resolvable:$true] %s1699_s23 }
 0x94d   : > { %s1701_s6 = sshll.u32 %s3084_s18, 4  ;;  %s1702_s6 = int_to_ptr.hbm [resolvable:$true] %s1701_s6 }
 0x94e   : > { %2050 = dma.vmem_to_hbm [thread:$0]  (%p2085_p4), %s1700_s23, 32, %s1702_s6, [#allocation5]  }
 0x94f   : > { %2513 = dma.done.wait (%p2085_p4), [#allocation5], 32  }
 0x950   : > { %2515 = vsyncadd (%p2085_p4), [#allocation5], 4294967264 }
 0x951 PF: > { %s3085_s3 = sld [smem:[#allocation21_spill]]  ;;  %s3088_s18 = smov %s2522_s19 }
 0x952   : > { %s3086_s21 = sld [smem:[#allocation20_spill]]  ;;  %s3089_s19 = smov %s2526_s20 }
 0x953   : > { %s3087_s22 = sld [smem:[#allocation22_spill]]  ;;  %s3090_s20 = smov %s2726_s26 }
 0x957   : > { %s29_s23 = sadd.s32 1, %s3085_s3  }
 0x958   : > { %p26_p5 = scmp.ge.s32.totalorder %s29_s23, 4  }
 0x95a   :  { %28 = sbr.rel (!%p26_p5) target bundleno = 23 (0x17), region = 186 }
 0x95f   :  { %1715 = vsyncpa [#allocation4], 1 }
 0x960   :  { %1717 = vsyncpa [#allocation4 + $0x1], 1 }
 0x961   :  { %1718 = vsyncpa [#allocation7], 1 }
 0x962   :  { %1719 = vsyncpa [#allocation10], 1 }
 0x963   :  { %1720 = vsyncpa [#allocation5], 1 }
 0x964   :  { %1722 = vsyncpa [#allocation5 + $0x1], 1 }

</bundles_post_ra>
